<compile_context>
chip_gen: v7x
topology: tpu7x:2x2x1
jax: 0.10.0
libtpu: 0.0.40
codegen_flags: <defaults>
</compile_context>

<pallas_src>
import functools

import jax
import jax.numpy as jnp
from jax import lax
from jax.experimental import pallas as pl
from jax.experimental.pallas import tpu as pltpu

_GUARD = 8  # sublane-aligned guard rows around the conv1 scratch


def _fold_bn(gamma, beta, mean, var, eps=1e-5):
    """Fold inference BatchNorm into per-channel scale/bias."""
    scale = gamma / jnp.sqrt(var + eps)
    bias = beta - mean * scale
    return scale.astype(jnp.float32), bias.astype(jnp.float32)


# ---------------- fused Pallas kernel ---------------- #

def _bottleneck_kernel(xt_ref, xm_ref, xb_ref,
                       w1_ref, b1_ref, w2_ref, b2_ref, w3_ref, b3_ref,
                       o_ref, t1s_ref):
    """conv1x1+BN+ReLU -> conv3x3+BN+ReLU -> conv1x1+BN + residual + ReLU.

    xt/xb: 1-row halo above/below the tile (index_map clamps at the image
           edge; masked to zero here so the 3x3 sees true zero row padding).
    xm:    the TH interior rows (also the residual input).
    t1s:   flat (guard + (TH+2)*W + guard, planes) conv1-output scratch.
    """
    _, TH, W, Cin = xm_ref.shape
    planes = w1_ref.shape[1]
    Cout = o_ref.shape[-1]
    NrW = (TH + 2) * W            # conv1 slab rows (incl. the 2 halo rows)
    Mt = TH * W                   # output rows of this tile
    cdt = t1s_ref.dtype

    r = pl.program_id(1)
    R = pl.num_programs(1)
    # Halo rows that fall outside the image must be zero *after* conv1+BN+ReLU.
    tmask = jnp.where(r == 0, 0.0, 1.0)
    bmask = jnp.where(r == R - 1, 0.0, 1.0)

    # ---- stage 1: one fused conv1x1 over the whole (TH+2)-row slab --------
    xm2 = xm_ref[0].reshape(Mt, Cin)
    x_slab = jnp.concatenate([xt_ref[0, 0], xm2, xb_ref[0, 0]], axis=0)
    t1 = jnp.dot(x_slab, w1_ref[...], preferred_element_type=jnp.float32)
    t1 = jnp.maximum(t1 + b1_ref[...], 0.0)
    rows = lax.broadcasted_iota(jnp.int32, (NrW, 1), 0)
    halo_mask = (jnp.where(rows < W, tmask, 1.0)
                 * jnp.where(rows >= (TH + 1) * W, bmask, 1.0))
    t1 = t1 * halo_mask

    # ---- one bulk, aligned store of the conv1 slab; zero only the guards --
    t1s_ref[pl.ds(0, _GUARD), :] = jnp.zeros((_GUARD, planes), cdt)
    t1s_ref[pl.ds(_GUARD + NrW, _GUARD), :] = jnp.zeros((_GUARD, planes), cdt)
    t1s_ref[pl.ds(_GUARD, NrW), :] = t1.astype(cdt)

    # ---- stage 2: 3x3 conv = 9 contiguous-slice matmuls, f32 accumulation -
    # Width zero-padding is emulated by masking the columns that wrap across
    # row boundaries in the flat layout (x==0 for kx=0, x==W-1 for kx=2).
    col = lax.broadcasted_iota(jnp.int32, (Mt, 1), 0) % W
    lmask = (col != 0).astype(cdt)
    rmask = (col != W - 1).astype(cdt)

    acc = None
    for t in range(9):
        ky, kx = divmod(t, 3)
        patch = t1s_ref[pl.ds(_GUARD + ky * W + kx - 1, Mt), :]
        if kx == 0:
            patch = patch * lmask
        elif kx == 2:
            patch = patch * rmask
        c = jnp.dot(patch, w2_ref[t], preferred_element_type=jnp.float32)
        acc = c if acc is None else acc + c

    # ---- stage 2 epilogue (bias + ReLU) directly on the valid rows ---------
    y2 = jnp.maximum(acc + b2_ref[...], 0.0).astype(cdt)

    # ---- stage 3: conv1x1 + bias + residual add + ReLU ---------------------
    y3 = jnp.dot(y2, w3_ref[...], preferred_element_type=jnp.float32)
    y3 = y3 + b3_ref[...] + xm2.astype(jnp.float32)
    o_ref[0] = jnp.maximum(y3, 0.0).reshape(TH, W, Cout).astype(o_ref.dtype)


# ---------------- wrapper ---------------- #

@functools.partial(jax.jit, static_argnames=("tile_h", "compute_dtype"))
def bottleneck_forward(x_nchw, params, *, tile_h=16, compute_dtype=jnp.float32):
    """Bottleneck forward (stride=1, dilation=1, downsample=None)."""
    x = jnp.transpose(x_nchw, (0, 2, 3, 1)).astype(compute_dtype)  # NCHW->NHWC
    N, H, W, Cin = x.shape
    planes = params["w1"].shape[1]
    Cout = params["w3"].shape[1]
    assert Cin == Cout, "downsample=None requires inplanes == planes*expansion"

    TH = tile_h if (H % tile_h == 0) else H
    R = H // TH

    s1, b1 = _fold_bn(*params["bn1"])
    s2, b2 = _fold_bn(*params["bn2"])
    s3, b3 = _fold_bn(*params["bn3"])
    # Fold BN scale into the conv weights -> in-kernel epilogue = bias + ReLU.
    w1s = (params["w1"] * s1[None, :]).astype(compute_dtype)
    w2s = (params["w2"] * s2[None, None, None, :]
           ).reshape(9, planes, planes).astype(compute_dtype)
    w3s = (params["w3"] * s3[None, :]).astype(compute_dtype)
    b1r = b1.reshape(1, planes)
    b2r = b2.reshape(1, planes)
    b3r = b3.reshape(1, Cout)

    in_specs = [
        # top halo row (clamped at the edge; masked in-kernel when r == 0)
        pl.BlockSpec((1, 1, W, Cin),
                     lambda n, r: (n, jnp.maximum(r * TH - 1, 0), 0, 0)),
        # TH interior rows (also the residual input)
        pl.BlockSpec((1, TH, W, Cin), lambda n, r: (n, r, 0, 0)),
        # bottom halo row (clamped; masked in-kernel when r == R-1)
        pl.BlockSpec((1, 1, W, Cin),
                     lambda n, r: (n, jnp.minimum((r + 1) * TH, H - 1), 0, 0)),
        # weights / biases: VMEM-resident across the whole grid
        pl.BlockSpec((Cin, planes), lambda n, r: (0, 0)),
        pl.BlockSpec((1, planes), lambda n, r: (0, 0)),
        pl.BlockSpec((9, planes, planes), lambda n, r: (0, 0, 0)),
        pl.BlockSpec((1, planes), lambda n, r: (0, 0)),
        pl.BlockSpec((planes, Cout), lambda n, r: (0, 0)),
        pl.BlockSpec((1, Cout), lambda n, r: (0, 0)),
    ]
    out_spec = pl.BlockSpec((1, TH, W, Cout), lambda n, r: (n, r, 0, 0))

    scratch_rows = (TH + 2) * W + 2 * _GUARD
    scratch_shapes = [pltpu.VMEM((scratch_rows, planes), compute_dtype)]

    itemsize = jnp.dtype(compute_dtype).itemsize
    # Per-step VMEM budget (double-buffered blocks + weights + scratch).
    blk_bytes = (
        2 * (TH + 2) * W * Cin * itemsize
        + 2 * TH * W * Cout * itemsize
        + 2 * (w1s.size + w2s.size + w3s.size) * itemsize
        + 2 * (b1r.size + b2r.size + b3r.size) * 4
        + scratch_rows * planes * itemsize)
    vmem_limit = int(min(max(3 * blk_bytes, 32 << 20), 64 << 20))  # v7x-safe cap

    flops = 2 * N * H * W * (Cin * planes + 9 * planes * planes + planes * Cout)
    bytes_accessed = int(
        N * H * W * (Cin + Cout) * itemsize          # x in + out
        + N * R * 2 * W * Cin * itemsize             # halo re-reads
        + (w1s.size + w2s.size + w3s.size) * itemsize
        + (b1r.size + b2r.size + b3r.size) * 4)

    out = pl.pallas_call(
        _bottleneck_kernel,
        out_shape=jax.ShapeDtypeStruct((N, H, W, Cout), compute_dtype),
        grid=(N, R),
        in_specs=in_specs,
        out_specs=out_spec,
        scratch_shapes=scratch_shapes,
        compiler_params=pltpu.CompilerParams(
            dimension_semantics=("parallel", "parallel"),
            vmem_limit_bytes=vmem_limit),
        cost_estimate=pl.CostEstimate(
            flops=flops, transcendentals=0, bytes_accessed=bytes_accessed),
    )(x, x, x, w1s, b1r, w2s, b2r, w3s, b3r)

    return jnp.transpose(out.astype(x_nchw.dtype), (0, 3, 1, 2))  # NHWC->NCHW


# ---------------- pure-JAX reference for validation ---------------- #

def _reference_forward(x_nchw, params):
    x = jnp.transpose(x_nchw, (0, 2, 3, 1))
    dn = ("NHWC", "HWIO", "NHWC")
    s1, b1 = _fold_bn(*params["bn1"])
    s2, b2 = _fold_bn(*params["bn2"])
    s3, b3 = _fold_bn(*params["bn3"])
    w1 = params["w1"][None, None]          # (1,1,Cin,planes)
    w3 = params["w3"][None, None]          # (1,1,planes,Cout)
    out = lax.conv_general_dilated(x, w1, (1, 1), "VALID", dimension_numbers=dn)
    out = jnp.maximum(out * s1 + b1, 0.0)
    out = lax.conv_general_dilated(out, params["w2"], (1, 1), ((1, 1), (1, 1)),
                                   dimension_numbers=dn)
    out = jnp.maximum(out * s2 + b2, 0.0)
    out = lax.conv_general_dilated(out, w3, (1, 1), "VALID", dimension_numbers=dn)
    out = out * s3 + b3 + x
    out = jnp.maximum(out, 0.0)
    return jnp.transpose(out, (0, 3, 1, 2))


# ---------------- deterministic params & run ---------------- #

def _bn_params(key, c):
    k1, k2, k3, k4 = jax.random.split(key, 4)
    gamma = 1.0 + 0.1 * jax.random.normal(k1, (c,), jnp.float32)
    beta = 0.1 * jax.random.normal(k2, (c,), jnp.float32)
    running_mean = 0.1 * jax.random.normal(k3, (c,), jnp.float32)
    running_var = 0.5 + jax.random.uniform(k4, (c,), jnp.float32)
    return gamma, beta, running_mean, running_var


def _make_case(key, n, inplanes, planes, h, w):
    k_x, k_w1, k_w2, k_w3, k_b1, k_b2, k_b3 = jax.random.split(key, 7)
    cout = inplanes  # == planes * expansion
    params = {
        # conv weights stored contraction-ready: (Cin,Cout) for 1x1, HWIO 3x3
        "w1": 0.1 * jax.random.normal(k_w1, (inplanes, planes), jnp.float32),
        "w2": 0.1 * jax.random.normal(k_w2, (3, 3, planes, planes), jnp.float32),
        "w3": 0.1 * jax.random.normal(k_w3, (planes, cout), jnp.float32),
        "bn1": _bn_params(k_b1, planes),
        "bn2": _bn_params(k_b2, planes),
        "bn3": _bn_params(k_b3, cout),
    }
    x = jax.random.normal(k_x, (n, inplanes, h, w), jnp.float32)  # NCHW
    return x, params


def _run_case(key, n, inplanes, planes, h, w, tile_h, compute_dtype, tol):
    x, params = _make_case(key, n, inplanes, planes, h, w)
    out = jax.block_until_ready(
        bottleneck_forward(x, params, tile_h=tile_h, compute_dtype=compute_dtype))
    ref = _reference_forward(x, params)
    assert out.shape == x.shape, (out.shape, x.shape)
    err = float(jnp.max(jnp.abs(out.astype(jnp.float32) - ref)))
    assert err < tol, f"max abs err {err} (tol {tol})"
    return err


if __name__ == "__main__":
    key = jax.random.PRNGKey(0)
    k1, k2 = jax.random.split(key)

    # f32, two row-tiles (edge halos on both sides exercised).
    _run_case(k1, n=2, inplanes=16, planes=4, h=16, w=16,
              tile_h=8, compute_dtype=jnp.float32, tol=1e-4)
    # f32, three row-tiles (fully-interior tile halos exercised), R > 2.
    _run_case(k2, n=1, inplanes=32, planes=8, h=24, w=24,
              tile_h=8, compute_dtype=jnp.float32, tol=1e-4)
    # bf16 compute path (f32 accumulation), loose tolerance.
    _run_case(k1, n=2, inplanes=16, planes=4, h=16, w=16,
              tile_h=8, compute_dtype=jnp.bfloat16, tol=0.15)

    print("KERNEL_OK")
</pallas_src>

<mosaic_0001>
module attributes {stable_mosaic.version = 11 : i64} {
  func.func @_bottleneck_kernel(%arg0: i32, %arg1: i32, %arg2: memref<1x1x16x16xf32, #tpu.memory_space<vmem>>, %arg3: memref<1x8x16x16xf32, #tpu.memory_space<vmem>>, %arg4: memref<1x1x16x16xf32, #tpu.memory_space<vmem>>, %arg5: memref<16x4xf32, #tpu.memory_space<vmem>>, %arg6: memref<1x4xf32, #tpu.memory_space<vmem>>, %arg7: memref<9x4x4xf32, #tpu.memory_space<vmem>>, %arg8: memref<1x4xf32, #tpu.memory_space<vmem>>, %arg9: memref<4x16xf32, #tpu.memory_space<vmem>>, %arg10: memref<1x16xf32, #tpu.memory_space<vmem>>, %arg11: memref<1x8x16x16xf32, #tpu.memory_space<vmem>>, %arg12: memref<176x4xf32, #tpu.memory_space<vmem>>) attributes {dimension_semantics = [#tpu.dimension_semantics<parallel>, #tpu.dimension_semantics<parallel>], iteration_bounds = array<i64: 2, 2>, scalar_prefetch = 0 : i64, scratch_operands = 1 : i64, tpu.core_type = #tpu.core_type<tc>, window_params = [{transform_indices = @transform_0, window_bounds = array<i64: 1, 1, 16, 16>}, {transform_indices = @transform_1, window_bounds = array<i64: 1, 8, 16, 16>}, {transform_indices = @transform_2, window_bounds = array<i64: 1, 1, 16, 16>}, {pipeline_mode = #tpu.pipeline_mode<synchronous>, transform_indices = @transform_3, window_bounds = array<i64: 16, 4>}, {pipeline_mode = #tpu.pipeline_mode<synchronous>, transform_indices = @transform_4, window_bounds = array<i64: 1, 4>}, {pipeline_mode = #tpu.pipeline_mode<synchronous>, transform_indices = @transform_5, window_bounds = array<i64: 9, 4, 4>}, {pipeline_mode = #tpu.pipeline_mode<synchronous>, transform_indices = @transform_6, window_bounds = array<i64: 1, 4>}, {pipeline_mode = #tpu.pipeline_mode<synchronous>, transform_indices = @transform_7, window_bounds = array<i64: 4, 16>}, {pipeline_mode = #tpu.pipeline_mode<synchronous>, transform_indices = @transform_8, window_bounds = array<i64: 1, 16>}, {transform_indices = @transform_9, window_bounds = array<i64: 1, 8, 16, 16>}]} {
    %c0_i32 = arith.constant 0 : i32
    %0 = arith.cmpi eq, %arg1, %c0_i32 : i32
    %cst = arith.constant 0.000000e+00 : f32
    %cst_0 = arith.constant 1.000000e+00 : f32
    %1 = arith.select %0, %cst, %cst_0 : f32
    %c1_i32 = arith.constant 1 : i32
    %2 = arith.cmpi eq, %arg1, %c1_i32 : i32
    %cst_1 = arith.constant 0.000000e+00 : f32
    %cst_2 = arith.constant 1.000000e+00 : f32
    %3 = arith.select %2, %cst_1, %cst_2 : f32
    %c0 = arith.constant 0 : index
    %c0_3 = arith.constant 0 : index
    %c0_4 = arith.constant 0 : index
    %c0_5 = arith.constant 0 : index
    %4 = vector.load %arg3[%c0, %c0_3, %c0_4, %c0_5] : memref<1x8x16x16xf32, #tpu.memory_space<vmem>>, vector<1x8x16x16xf32>
    %5 = vector.shape_cast %4 : vector<1x8x16x16xf32> to vector<8x16x16xf32>
    %6 = vector.shape_cast %5 : vector<8x16x16xf32> to vector<128x16xf32>
    %c0_6 = arith.constant 0 : index
    %c0_7 = arith.constant 0 : index
    %c0_8 = arith.constant 0 : index
    %c0_9 = arith.constant 0 : index
    %7 = vector.load %arg2[%c0_6, %c0_7, %c0_8, %c0_9] : memref<1x1x16x16xf32, #tpu.memory_space<vmem>>, vector<1x1x16x16xf32>
    %8 = vector.shape_cast %7 : vector<1x1x16x16xf32> to vector<16x16xf32>
    %c0_10 = arith.constant 0 : index
    %c0_11 = arith.constant 0 : index
    %c0_12 = arith.constant 0 : index
    %c0_13 = arith.constant 0 : index
    %9 = vector.load %arg4[%c0_10, %c0_11, %c0_12, %c0_13] : memref<1x1x16x16xf32, #tpu.memory_space<vmem>>, vector<1x1x16x16xf32>
    %10 = vector.shape_cast %9 : vector<1x1x16x16xf32> to vector<16x16xf32>
    %11 = tpu.concatenate %8, %6, %10 in 0 : vector<16x16xf32>, vector<128x16xf32>, vector<16x16xf32> -> vector<160x16xf32>
    %c0_14 = arith.constant 0 : index
    %c0_15 = arith.constant 0 : index
    %12 = vector.load %arg5[%c0_14, %c0_15] : memref<16x4xf32, #tpu.memory_space<vmem>>, vector<16x4xf32>
    %cst_16 = arith.constant dense<0.000000e+00> : vector<160x4xf32>
    %13 = tpu.matmul %11, %12, %cst_16 {dimension_numbers = #tpu.dot_dimension_numbers<[1], [0], [0], [1], [0, 0, 1, 1], [], []>} : vector<160x16xf32>, vector<16x4xf32>, vector<160x4xf32> -> vector<160x4xf32>
    %c0_17 = arith.constant 0 : index
    %c0_18 = arith.constant 0 : index
    %14 = vector.load %arg6[%c0_17, %c0_18] : memref<1x4xf32, #tpu.memory_space<vmem>>, vector<1x4xf32>
    %15 = vector.broadcast %14 : vector<1x4xf32> to vector<160x4xf32>
    %16 = arith.addf %13, %15 : vector<160x4xf32>
    %cst_19 = arith.constant 0.000000e+00 : f32
    %17 = vector.broadcast %cst_19 : f32 to vector<160x4xf32>
    %18 = arith.maximumf %16, %17 : vector<160x4xf32>
    %19 = tpu.iota {dimensions = array<i32: 0>} : vector<160x1xi32>
    %c16_i32 = arith.constant 16 : i32
    %20 = vector.broadcast %c16_i32 : i32 to vector<160x1xi32>
    %21 = arith.cmpi slt, %19, %20 : vector<160x1xi32>
    %cst_20 = arith.constant 1.000000e+00 : f32
    %22 = vector.broadcast %1 : f32 to vector<160x1xf32>
    %23 = vector.broadcast %cst_20 : f32 to vector<160x1xf32>
    %24 = arith.select %21, %22, %23 : vector<160x1xi1>, vector<160x1xf32>
    %c144_i32 = arith.constant 144 : i32
    %25 = vector.broadcast %c144_i32 : i32 to vector<160x1xi32>
    %26 = arith.cmpi sge, %19, %25 : vector<160x1xi32>
    %cst_21 = arith.constant 1.000000e+00 : f32
    %27 = vector.broadcast %3 : f32 to vector<160x1xf32>
    %28 = vector.broadcast %cst_21 : f32 to vector<160x1xf32>
    %29 = arith.select %26, %27, %28 : vector<160x1xi1>, vector<160x1xf32>
    %30 = arith.mulf %24, %29 : vector<160x1xf32>
    %31 = vector.broadcast %30 : vector<160x1xf32> to vector<160x4xf32>
    %32 = arith.mulf %18, %31 : vector<160x4xf32>
    %cst_22 = arith.constant 0.000000e+00 : f32
    %33 = vector.broadcast %cst_22 : f32 to vector<8x4xf32>
    %c0_23 = arith.constant 0 : index
    %c0_24 = arith.constant 0 : index
    %34 = vector.load %arg12[%c0_23, %c0_24] : memref<176x4xf32, #tpu.memory_space<vmem>>, vector<8x4xf32>
    tpu.vector_store %arg12[%c0_23, %c0_24], %33 {strides = array<i32>} : memref<176x4xf32, #tpu.memory_space<vmem>>, vector<8x4xf32>,
    %cst_25 = arith.constant 0.000000e+00 : f32
    %35 = vector.broadcast %cst_25 : f32 to vector<8x4xf32>
    %c168 = arith.constant 168 : index
    %c0_26 = arith.constant 0 : index
    %36 = vector.load %arg12[%c168, %c0_26] : memref<176x4xf32, #tpu.memory_space<vmem>>, vector<8x4xf32>
    tpu.vector_store %arg12[%c168, %c0_26], %35 {strides = array<i32>} : memref<176x4xf32, #tpu.memory_space<vmem>>, vector<8x4xf32>,
    %c8 = arith.constant 8 : index
    %c0_27 = arith.constant 0 : index
    %37 = vector.load %arg12[%c8, %c0_27] : memref<176x4xf32, #tpu.memory_space<vmem>>, vector<160x4xf32>
    tpu.vector_store %arg12[%c8, %c0_27], %32 {strides = array<i32>} : memref<176x4xf32, #tpu.memory_space<vmem>>, vector<160x4xf32>,
    %38 = tpu.iota {dimensions = array<i32: 0>} : vector<128x1xi32>
    %c16_i32_28 = arith.constant 16 : i32
    %c0_i32_29 = arith.constant 0 : i32
    %39 = arith.cmpi eq, %c16_i32_28, %c0_i32_29 : i32
    %c1_i32_30 = arith.constant 1 : i32
    %40 = arith.select %39, %c1_i32_30, %c16_i32_28 : i32
    %41 = vector.broadcast %40 : i32 to vector<128x1xi32>
    %42 = arith.remsi %38, %41 : vector<128x1xi32>
    %c0_i32_31 = arith.constant 0 : i32
    %43 = vector.broadcast %c0_i32_31 : i32 to vector<128x1xi32>
    %44 = arith.cmpi ne, %42, %43 : vector<128x1xi32>
    %c0_i32_32 = arith.constant 0 : i32
    %45 = vector.broadcast %c0_i32_32 : i32 to vector<128x1xi32>
    %46 = arith.cmpi slt, %42, %45 : vector<128x1xi32>
    %c0_i32_33 = arith.constant 0 : i32
    %47 = arith.cmpi slt, %40, %c0_i32_33 : i32
    %48 = vector.broadcast %47 : i1 to vector<128x1xi1>
    %49 = vector.broadcast %48 : vector<128x1xi1> to vector<128x1xi1>
    %50 = arith.xori %46, %49 : vector<128x1xi1>
    %51 = arith.andi %50, %44 : vector<128x1xi1>
    %52 = vector.broadcast %40 : i32 to vector<128x1xi32>
    %53 = arith.addi %42, %52 : vector<128x1xi32>
    %54 = arith.select %51, %53, %42 : vector<128x1xi1>, vector<128x1xi32>
    %c0_i32_34 = arith.constant 0 : i32
    %55 = vector.broadcast %c0_i32_34 : i32 to vector<128x1xi32>
    %56 = arith.cmpi ne, %54, %55 : vector<128x1xi32>
    %57 = arith.extui %56 : vector<128x1xi1> to vector<128x1xi32>
    %58 = arith.sitofp %57 : vector<128x1xi32> to vector<128x1xf32>
    %c15_i32 = arith.constant 15 : i32
    %59 = vector.broadcast %c15_i32 : i32 to vector<128x1xi32>
    %60 = arith.cmpi ne, %54, %59 : vector<128x1xi32>
    %61 = arith.extui %60 : vector<128x1xi1> to vector<128x1xi32>
    %62 = arith.sitofp %61 : vector<128x1xi32> to vector<128x1xf32>
    %c7 = arith.constant 7 : index
    %c0_35 = arith.constant 0 : index
    %63 = vector.load %arg12[%c7, %c0_35] : memref<176x4xf32, #tpu.memory_space<vmem>>, vector<128x4xf32>
    %64 = vector.broadcast %58 : vector<128x1xf32> to vector<128x4xf32>
    %65 = arith.mulf %63, %64 : vector<128x4xf32>
    %c0_36 = arith.constant 0 : index
    %c0_37 = arith.constant 0 : index
    %c0_38 = arith.constant 0 : index
    %66 = vector.load %arg7[%c0_36, %c0_37, %c0_38] : memref<9x4x4xf32, #tpu.memory_space<vmem>>, vector<1x4x4xf32>
    %67 = vector.shape_cast %66 : vector<1x4x4xf32> to vector<4x4xf32>
    %cst_39 = arith.constant dense<0.000000e+00> : vector<128x4xf32>
    %68 = tpu.matmul %65, %67, %cst_39 {dimension_numbers = #tpu.dot_dimension_numbers<[1], [0], [0], [1], [0, 0, 1, 1], [], []>} : vector<128x4xf32>, vector<4x4xf32>, vector<128x4xf32> -> vector<128x4xf32>
    %c8_40 = arith.constant 8 : index
    %c0_41 = arith.constant 0 : index
    %69 = vector.load %arg12[%c8_40, %c0_41] : memref<176x4xf32, #tpu.memory_space<vmem>>, vector<128x4xf32>
    %c1 = arith.constant 1 : index
    %c0_42 = arith.constant 0 : index
    %c0_43 = arith.constant 0 : index
    %70 = vector.load %arg7[%c1, %c0_42, %c0_43] : memref<9x4x4xf32, #tpu.memory_space<vmem>>, vector<1x4x4xf32>
    %71 = vector.shape_cast %70 : vector<1x4x4xf32> to vector<4x4xf32>
    %cst_44 = arith.constant dense<0.000000e+00> : vector<128x4xf32>
    %72 = tpu.matmul %69, %71, %cst_44 {dimension_numbers = #tpu.dot_dimension_numbers<[1], [0], [0], [1], [0, 0, 1, 1], [], []>} : vector<128x4xf32>, vector<4x4xf32>, vector<128x4xf32> -> vector<128x4xf32>
    %73 = arith.addf %68, %72 : vector<128x4xf32>
    %c9 = arith.constant 9 : index
    %c0_45 = arith.constant 0 : index
    %74 = vector.load %arg12[%c9, %c0_45] : memref<176x4xf32, #tpu.memory_space<vmem>>, vector<128x4xf32>
    %75 = vector.broadcast %62 : vector<128x1xf32> to vector<128x4xf32>
    %76 = arith.mulf %74, %75 : vector<128x4xf32>
    %c2 = arith.constant 2 : index
    %c0_46 = arith.constant 0 : index
    %c0_47 = arith.constant 0 : index
    %77 = vector.load %arg7[%c2, %c0_46, %c0_47] : memref<9x4x4xf32, #tpu.memory_space<vmem>>, vector<1x4x4xf32>
    %78 = vector.shape_cast %77 : vector<1x4x4xf32> to vector<4x4xf32>
    %cst_48 = arith.constant dense<0.000000e+00> : vector<128x4xf32>
    %79 = tpu.matmul %76, %78, %cst_48 {dimension_numbers = #tpu.dot_dimension_numbers<[1], [0], [0], [1], [0, 0, 1, 1], [], []>} : vector<128x4xf32>, vector<4x4xf32>, vector<128x4xf32> -> vector<128x4xf32>
    %80 = arith.addf %73, %79 : vector<128x4xf32>
    %c23 = arith.constant 23 : index
    %c0_49 = arith.constant 0 : index
    %81 = vector.load %arg12[%c23, %c0_49] : memref<176x4xf32, #tpu.memory_space<vmem>>, vector<128x4xf32>
    %82 = vector.broadcast %58 : vector<128x1xf32> to vector<128x4xf32>
    %83 = arith.mulf %81, %82 : vector<128x4xf32>
    %c3 = arith.constant 3 : index
    %c0_50 = arith.constant 0 : index
    %c0_51 = arith.constant 0 : index
    %84 = vector.load %arg7[%c3, %c0_50, %c0_51] : memref<9x4x4xf32, #tpu.memory_space<vmem>>, vector<1x4x4xf32>
    %85 = vector.shape_cast %84 : vector<1x4x4xf32> to vector<4x4xf32>
    %cst_52 = arith.constant dense<0.000000e+00> : vector<128x4xf32>
    %86 = tpu.matmul %83, %85, %cst_52 {dimension_numbers = #tpu.dot_dimension_numbers<[1], [0], [0], [1], [0, 0, 1, 1], [], []>} : vector<128x4xf32>, vector<4x4xf32>, vector<128x4xf32> -> vector<128x4xf32>
    %87 = arith.addf %80, %86 : vector<128x4xf32>
    %c24 = arith.constant 24 : index
    %c0_53 = arith.constant 0 : index
    %88 = vector.load %arg12[%c24, %c0_53] : memref<176x4xf32, #tpu.memory_space<vmem>>, vector<128x4xf32>
    %c4 = arith.constant 4 : index
    %c0_54 = arith.constant 0 : index
    %c0_55 = arith.constant 0 : index
    %89 = vector.load %arg7[%c4, %c0_54, %c0_55] : memref<9x4x4xf32, #tpu.memory_space<vmem>>, vector<1x4x4xf32>
    %90 = vector.shape_cast %89 : vector<1x4x4xf32> to vector<4x4xf32>
    %cst_56 = arith.constant dense<0.000000e+00> : vector<128x4xf32>
    %91 = tpu.matmul %88, %90, %cst_56 {dimension_numbers = #tpu.dot_dimension_numbers<[1], [0], [0], [1], [0, 0, 1, 1], [], []>} : vector<128x4xf32>, vector<4x4xf32>, vector<128x4xf32> -> vector<128x4xf32>
    %92 = arith.addf %87, %91 : vector<128x4xf32>
    %c25 = arith.constant 25 : index
    %c0_57 = arith.constant 0 : index
    %93 = vector.load %arg12[%c25, %c0_57] : memref<176x4xf32, #tpu.memory_space<vmem>>, vector<128x4xf32>
    %94 = vector.broadcast %62 : vector<128x1xf32> to vector<128x4xf32>
    %95 = arith.mulf %93, %94 : vector<128x4xf32>
    %c5 = arith.constant 5 : index
    %c0_58 = arith.constant 0 : index
    %c0_59 = arith.constant 0 : index
    %96 = vector.load %arg7[%c5, %c0_58, %c0_59] : memref<9x4x4xf32, #tpu.memory_space<vmem>>, vector<1x4x4xf32>
    %97 = vector.shape_cast %96 : vector<1x4x4xf32> to vector<4x4xf32>
    %cst_60 = arith.constant dense<0.000000e+00> : vector<128x4xf32>
    %98 = tpu.matmul %95, %97, %cst_60 {dimension_numbers = #tpu.dot_dimension_numbers<[1], [0], [0], [1], [0, 0, 1, 1], [], []>} : vector<128x4xf32>, vector<4x4xf32>, vector<128x4xf32> -> vector<128x4xf32>
    %99 = arith.addf %92, %98 : vector<128x4xf32>
    %c39 = arith.constant 39 : index
    %c0_61 = arith.constant 0 : index
    %100 = vector.load %arg12[%c39, %c0_61] : memref<176x4xf32, #tpu.memory_space<vmem>>, vector<128x4xf32>
    %101 = vector.broadcast %58 : vector<128x1xf32> to vector<128x4xf32>
    %102 = arith.mulf %100, %101 : vector<128x4xf32>
    %c6 = arith.constant 6 : index
    %c0_62 = arith.constant 0 : index
    %c0_63 = arith.constant 0 : index
    %103 = vector.load %arg7[%c6, %c0_62, %c0_63] : memref<9x4x4xf32, #tpu.memory_space<vmem>>, vector<1x4x4xf32>
    %104 = vector.shape_cast %103 : vector<1x4x4xf32> to vector<4x4xf32>
    %cst_64 = arith.constant dense<0.000000e+00> : vector<128x4xf32>
    %105 = tpu.matmul %102, %104, %cst_64 {dimension_numbers = #tpu.dot_dimension_numbers<[1], [0], [0], [1], [0, 0, 1, 1], [], []>} : vector<128x4xf32>, vector<4x4xf32>, vector<128x4xf32> -> vector<128x4xf32>
    %106 = arith.addf %99, %105 : vector<128x4xf32>
    %c40 = arith.constant 40 : index
    %c0_65 = arith.constant 0 : index
    %107 = vector.load %arg12[%c40, %c0_65] : memref<176x4xf32, #tpu.memory_space<vmem>>, vector<128x4xf32>
    %c7_66 = arith.constant 7 : index
    %c0_67 = arith.constant 0 : index
    %c0_68 = arith.constant 0 : index
    %108 = vector.load %arg7[%c7_66, %c0_67, %c0_68] : memref<9x4x4xf32, #tpu.memory_space<vmem>>, vector<1x4x4xf32>
    %109 = vector.shape_cast %108 : vector<1x4x4xf32> to vector<4x4xf32>
    %cst_69 = arith.constant dense<0.000000e+00> : vector<128x4xf32>
    %110 = tpu.matmul %107, %109, %cst_69 {dimension_numbers = #tpu.dot_dimension_numbers<[1], [0], [0], [1], [0, 0, 1, 1], [], []>} : vector<128x4xf32>, vector<4x4xf32>, vector<128x4xf32> -> vector<128x4xf32>
    %111 = arith.addf %106, %110 : vector<128x4xf32>
    %c41 = arith.constant 41 : index
    %c0_70 = arith.constant 0 : index
    %112 = vector.load %arg12[%c41, %c0_70] : memref<176x4xf32, #tpu.memory_space<vmem>>, vector<128x4xf32>
    %113 = vector.broadcast %62 : vector<128x1xf32> to vector<128x4xf32>
    %114 = arith.mulf %112, %113 : vector<128x4xf32>
    %c8_71 = arith.constant 8 : index
    %c0_72 = arith.constant 0 : index
    %c0_73 = arith.constant 0 : index
    %115 = vector.load %arg7[%c8_71, %c0_72, %c0_73] : memref<9x4x4xf32, #tpu.memory_space<vmem>>, vector<1x4x4xf32>
    %116 = vector.shape_cast %115 : vector<1x4x4xf32> to vector<4x4xf32>
    %cst_74 = arith.constant dense<0.000000e+00> : vector<128x4xf32>
    %117 = tpu.matmul %114, %116, %cst_74 {dimension_numbers = #tpu.dot_dimension_numbers<[1], [0], [0], [1], [0, 0, 1, 1], [], []>} : vector<128x4xf32>, vector<4x4xf32>, vector<128x4xf32> -> vector<128x4xf32>
    %118 = arith.addf %111, %117 : vector<128x4xf32>
    %c0_75 = arith.constant 0 : index
    %c0_76 = arith.constant 0 : index
    %119 = vector.load %arg8[%c0_75, %c0_76] : memref<1x4xf32, #tpu.memory_space<vmem>>, vector<1x4xf32>
    %120 = vector.broadcast %119 : vector<1x4xf32> to vector<128x4xf32>
    %121 = arith.addf %118, %120 : vector<128x4xf32>
    %cst_77 = arith.constant 0.000000e+00 : f32
    %122 = vector.broadcast %cst_77 : f32 to vector<128x4xf32>
    %123 = arith.maximumf %121, %122 : vector<128x4xf32>
    %c0_78 = arith.constant 0 : index
    %c0_79 = arith.constant 0 : index
    %124 = vector.load %arg9[%c0_78, %c0_79] : memref<4x16xf32, #tpu.memory_space<vmem>>, vector<4x16xf32>
    %cst_80 = arith.constant dense<0.000000e+00> : vector<128x16xf32>
    %125 = tpu.matmul %123, %124, %cst_80 {dimension_numbers = #tpu.dot_dimension_numbers<[1], [0], [0], [1], [0, 0, 1, 1], [], []>} : vector<128x4xf32>, vector<4x16xf32>, vector<128x16xf32> -> vector<128x16xf32>
    %c0_81 = arith.constant 0 : index
    %c0_82 = arith.constant 0 : index
    %126 = vector.load %arg10[%c0_81, %c0_82] : memref<1x16xf32, #tpu.memory_space<vmem>>, vector<1x16xf32>
    %127 = vector.broadcast %126 : vector<1x16xf32> to vector<128x16xf32>
    %128 = arith.addf %125, %127 : vector<128x16xf32>
    %129 = arith.addf %128, %6 : vector<128x16xf32>
    %cst_83 = arith.constant 0.000000e+00 : f32
    %130 = vector.broadcast %cst_83 : f32 to vector<128x16xf32>
    %131 = arith.maximumf %129, %130 : vector<128x16xf32>
    %132 = vector.shape_cast %131 : vector<128x16xf32> to vector<8x16x16xf32>
    %c0_84 = arith.constant 0 : index
    %c0_85 = arith.constant 0 : index
    %c0_86 = arith.constant 0 : index
    %c0_87 = arith.constant 0 : index
    %133 = vector.load %arg11[%c0_84, %c0_85, %c0_86, %c0_87] : memref<1x8x16x16xf32, #tpu.memory_space<vmem>>, vector<1x8x16x16xf32>
    %134 = vector.shape_cast %133 : vector<1x8x16x16xf32> to vector<8x16x16xf32>
    %135 = vector.shape_cast %132 : vector<8x16x16xf32> to vector<1x8x16x16xf32>
    tpu.vector_store %arg11[%c0_84, %c0_85, %c0_86, %c0_87], %135 {strides = array<i32>} : memref<1x8x16x16xf32, #tpu.memory_space<vmem>>, vector<1x8x16x16xf32>,
    return
  }
  func.func @transform_0(%arg0: i32, %arg1: i32) -> (i32, i32, i32, i32) {
    %c8_i32 = arith.constant 8 : i32
    %0 = arith.muli %arg1, %c8_i32 : i32
    %c1_i32 = arith.constant 1 : i32
    %1 = arith.subi %0, %c1_i32 : i32
    %c0_i32 = arith.constant 0 : i32
    %2 = arith.maxsi %1, %c0_i32 : i32
    %c0_i32_0 = arith.constant 0 : i32
    %c0_i32_1 = arith.constant 0 : i32
    %c0_i32_2 = arith.constant 0 : i32
    return %arg0, %2, %c0_i32_0, %c0_i32_1 : i32, i32, i32, i32
  }
  func.func @transform_1(%arg0: i32, %arg1: i32) -> (i32, i32, i32, i32) {
    %c0_i32 = arith.constant 0 : i32
    %c0_i32_0 = arith.constant 0 : i32
    %c0_i32_1 = arith.constant 0 : i32
    return %arg0, %arg1, %c0_i32, %c0_i32_0 : i32, i32, i32, i32
  }
  func.func @transform_2(%arg0: i32, %arg1: i32) -> (i32, i32, i32, i32) {
    %c1_i32 = arith.constant 1 : i32
    %0 = arith.addi %arg1, %c1_i32 : i32
    %c8_i32 = arith.constant 8 : i32
    %1 = arith.muli %0, %c8_i32 : i32
    %c15_i32 = arith.constant 15 : i32
    %2 = arith.minsi %1, %c15_i32 : i32
    %c0_i32 = arith.constant 0 : i32
    %c0_i32_0 = arith.constant 0 : i32
    %c0_i32_1 = arith.constant 0 : i32
    return %arg0, %2, %c0_i32, %c0_i32_0 : i32, i32, i32, i32
  }
  func.func @transform_3(%arg0: i32, %arg1: i32) -> (i32, i32) {
    %c0_i32 = arith.constant 0 : i32
    %c0_i32_0 = arith.constant 0 : i32
    %c0_i32_1 = arith.constant 0 : i32
    return %c0_i32, %c0_i32_0 : i32, i32
  }
  func.func @transform_4(%arg0: i32, %arg1: i32) -> (i32, i32) {
    %c0_i32 = arith.constant 0 : i32
    %c0_i32_0 = arith.constant 0 : i32
    %c0_i32_1 = arith.constant 0 : i32
    return %c0_i32, %c0_i32_0 : i32, i32
  }
  func.func @transform_5(%arg0: i32, %arg1: i32) -> (i32, i32, i32) {
    %c0_i32 = arith.constant 0 : i32
    %c0_i32_0 = arith.constant 0 : i32
    %c0_i32_1 = arith.constant 0 : i32
    %c0_i32_2 = arith.constant 0 : i32
    return %c0_i32, %c0_i32_0, %c0_i32_1 : i32, i32, i32
  }
  func.func @transform_6(%arg0: i32, %arg1: i32) -> (i32, i32) {
    %c0_i32 = arith.constant 0 : i32
    %c0_i32_0 = arith.constant 0 : i32
    %c0_i32_1 = arith.constant 0 : i32
    return %c0_i32, %c0_i32_0 : i32, i32
  }
  func.func @transform_7(%arg0: i32, %arg1: i32) -> (i32, i32) {
    %c0_i32 = arith.constant 0 : i32
    %c0_i32_0 = arith.constant 0 : i32
    %c0_i32_1 = arith.constant 0 : i32
    return %c0_i32, %c0_i32_0 : i32, i32
  }
  func.func @transform_8(%arg0: i32, %arg1: i32) -> (i32, i32) {
    %c0_i32 = arith.constant 0 : i32
    %c0_i32_0 = arith.constant 0 : i32
    %c0_i32_1 = arith.constant 0 : i32
    return %c0_i32, %c0_i32_0 : i32, i32
  }
  func.func @transform_9(%arg0: i32, %arg1: i32) -> (i32, i32, i32, i32) {
    %c0_i32 = arith.constant 0 : i32
    %c0_i32_0 = arith.constant 0 : i32
    %c0_i32_1 = arith.constant 0 : i32
    return %arg0, %arg1, %c0_i32, %c0_i32_0 : i32, i32, i32, i32
  }
}

</mosaic_0001>

<bundles_post_ra>
// kernel: bottleneck_forward.1
= control target key start
LH: loop header
LB: loop body
LE: loop exit
PB: predicated region body
PF: predicated region fallthrough
CT: control target
= control target key end

     0   :  { %s4831_s30 = smov 0   ;;  %s4833_s10 = smov 0   ;;  %s5762_s0 = inlined_call_operand.vmem [shape: f32[2,16,16,16], index: 0, kind: input, shape index: {}, may-alias: {0,1,2}]   ;;  %s5763_s1 = inlined_call_operand.vmem [shape: f32[2,16,16,16], index: 1, kind: input, shape index: {}, may-alias: {0,1,2}]   ;;  %s5764_s2 = inlined_call_operand.vmem [shape: f32[2,16,16,16], index: 2, kind: input, shape index: {}, may-alias: {0,1,2}]   ;;  %s5765_s3 = inlined_call_operand.vmem [shape: f32[16,4], index: 3, kind: input, shape index: {}]   ;;  %s5766_s4 = inlined_call_operand.vmem [shape: f32[1,4], index: 4, kind: input, shape index: {}]   ;;  %s5767_s5 = inlined_call_operand.vmem [shape: f32[9,4,4], index: 5, kind: input, shape index: {}]   ;;  %s5768_s6 = inlined_call_operand.vmem [shape: f32[1,4], index: 6, kind: input, shape index: {}]   ;;  %s5769_s7 = inlined_call_operand.vmem [shape: f32[4,16], index: 7, kind: input, shape index: {}]   ;;  %s5770_s8 = inlined_call_operand.vmem [shape: f32[1,16], index: 8, kind: input, shape index: {}]   ;;  %s5771_s9 = inlined_call_operand.vmem [shape: f32[2,16,16,16], index: 9, kind: output, shape index: {}]  }
   0x1   :  { %5772 = sst [smem:[#allocation8_spill]] %s5765_s3  ;;  %s4835_s11 = smov 0  }
   0x2   :  { %s4837_s12 = smov 0   ;;  %s4839_s13 = smov 0  }
   0x3 LB: > { %s28_s14 = sadd.s32 1, %s4770_s11  ;;  %s31_s15 = sadd.s32 1, %s4774_s12  ;;  %s4778_s13 = sphi %s4839_s13, %s19_s13   ;;  %s4774_s12 = sphi %s4837_s12, %s5802_s12   ;;  %s4770_s11 = sphi %s4835_s11, %s5801_s11   ;;  %s4766_s10 = sphi %s4833_s10, %s5800_s10   ;;  %s4762_s30 = sphi %s4831_s30, %s5799_s30  }
   0x4   : > { %p29_p0 = scmp.ge.s32.totalorder %s28_s14, 2  ;;  %p3810_p1 = scmp.ge.s32.totalorder %s4778_s13, 1 }
   0x5   : > { %p373_p2 = scmp.lt.s32.totalorder %s4778_s13, 5 }
   0x6   : > { %s5804_s14 = smov (%p29_p0, %s28_s14), 0  ;;  %s5806_s15 = smov (!%p29_p0, %s31_s15), %s4774_s12 }
   0x7   : > { %p374_p3 = pnand %p3810_p1, %p373_p2  ;;  %p33_p4 = scmp.ge.s32.totalorder %s5806_s15, 2 }
   0x9   : > { %s5808_s15 = smov (%p33_p4, %s5806_s15), 0  ;;  %377 = sbr.rel (%p374_p3) target bundleno = 890 (0x37a), region = 56 }
  0x10   : > { %s5773_s3 = sld [smem:[#allocation8_spill]]  ;;  %s4870_s20 = sshll.u32 %s4762_s30, 3  ;;  %vm534_vm0 = vcmask 130048   ;;  %vm923_vm1 = vcmask 31744   ;;  %v4780_v23 = vmov 0.0   ;;  %vm1333_vm2 = vcmask 1043456  }
  0x11   : > { %p449_p5 = scmp.lt.s32.totalorder %s4766_s10, 1  ;;  %s3812_s21 = sadd.s32 4294967295, %s4870_s20  ;;  %924 = vst.msk [vmem:[#allocation2] sm:$0xff] %vm923_vm1, %v4780_v23  ;;  %925 = vst.msk [vmem:[#allocation2 + $0xa8] sm:$0xff] %vm923_vm1, %v4780_v23  ;;  %v3873_v24 = vld [vmem:[%s5767_s5 + $0x4] sm:$0xf]  ;;  %v780_v25 = vlaneseq }
  0x12   : > { %p465_p6 = scmp.lt.s32.totalorder %s4870_s20, 15  ;;  %p447_p7 = scmp.gt.s32.totalorder %s3812_s21, 0  ;;  %v4956_v28 = vld [vmem:[%s5767_s5 + $0xc] sm:$0xf]  ;;  %v4969_v33 = vld [vmem:[%s5767_s5 + $0x10] sm:$0xf] }
  0x13   : > { %p3813_p8 = scmp.lt.s32.totalorder %s3812_s21, 15  ;;  %s5810_s10 = smov (!%p449_p5, %s4766_s10), 1  ;;  %v4950_v26 = vshrl.u32 %v780_v25, 7  ;;  %4553 = vmatprep.subr.msk.mxu1 %vm1333_vm2, %v4956_v28  ;;  %v1266_v43 = vld [vmem:[%s5767_s5] sm:$0xf] }
  0x14   : > { %s5812_s21 = smov (!%p447_p7, %s3812_s21), 0  ;;  %s4874_s22 = sshll.u32 %s5810_s10, 5  ;;  %4554 = vmatpush3.msk.msra.mxu1 %vm1333_vm2, %v4956_v28  ;;  %v4996_v45 = vld [vmem:[%s5766_s4] ss:$0 sm:$0xff] }
  0x15   : > { %s5814_s21 = smov (!%p3813_p8, %s5812_s21), 15  ;;  %v788_v27 = vadd.s32 56, %v4950_v26  ;;  %v790_v30 = vadd.s32 72, %v4950_v26  ;;  %v792_v34 = vadd.s32 88, %v4950_v26  ;;  %4393 = vmatprep.subr.msk.mxu1 %vm1333_vm2, %v4969_v33  ;;  %v794_v37 = vadd.s32 104, %v4950_v26  ;;  %p501_p10 = scmp.eq.s32.totalorder %s4762_s30, 0 }
  0x16   : > { %v525_v0 = vld [vmem:[%s5773_s3] sm:$0xff]  ;;  %v526_v1 = vld [vmem:[%s5773_s3 + $0x8] sm:$0xff]  ;;  %s466_s23 = scalar_select %p465_p6, %s4870_s20, 15  ;;  %v796_v40 = vadd.s32 120, %v4950_v26 }
  0x17   : > { %v4549_v2 = vpack.c.bf16 %v526_v1, %v525_v0  ;;  %s3818_s24 = sshll.u32 %s5814_s21, 1  ;;  %s4062_s21 = sadd.s32 8, %s4870_s20  ;;  %v999_v29 = vand.u32 15, %v788_v27  ;;  %v1013_v32 = vand.u32 15, %v790_v30  ;;  %v1027_v36 = vand.u32 15, %v792_v34 }
  0x18   : > { %s455_s25 = sadd.s32 %s4874_s22, %s3818_s24  ;;  %s3822_s26 = sshll.u32 %s466_s23, 1  ;;  %v1041_v39 = vand.u32 15, %v794_v37  ;;  %v1055_v42 = vand.u32 15, %v796_v40  ;;  %v784_v27 = vadd.s32 24, %v4950_v26  ;;  %v786_v40 = vadd.s32 40, %v4950_v26 }
  0x19   : > { %4550 = vmatprep.subr.bf16.mxu0 %v4549_v2  ;;  %s3820_s27 = sshll.u32 %s455_s25, 3  ;;  %s4879_s28 = sadd.s32 %s3822_s26, %s4874_s22  ;;  %vm1193_vm3 = vcmp.ne.s32.totalorder %v999_v29, 15  ;;  %vm1195_vm4 = vcmp.ne.s32.totalorder %v1013_v32, 15  ;;  %vm1197_vm5 = vcmp.ne.s32.totalorder %v1027_v36, 15 }
  0x1a   : > { %4552 = vmatpush3.bf16.msra.mxu0 %v4549_v2  ;;  %s457_s17 = scalar_lea.vmem %s5762_s0, %s3820_s27  ;;  %s3824_s10 = sshll.u32 %s4879_s28, 3  ;;  %v4964_v31 = vsel %vm1193_vm3, 1.0, %v4780_v23  ;;  %v4975_v35 = vsel %vm1195_vm4, 1.0, %v4780_v23  ;;  %v4979_v38 = vsel %vm1197_vm5, 1.0, %v4780_v23  ;;  %vm1199_vm6 = vcmp.ne.s32.totalorder %v1041_v39, 15 }
  0x1b   : > { %s4890_s3 = scalar_lea.vmem %s5763_s1, %s3824_s10  ;;  %v521_v3 = vld [vmem:[%s457_s17] sm:$0xff]  ;;  %v522_v4 = vld [vmem:[%s457_s17 + $0x8] sm:$0xff]  ;;  %p4903_p9 = scmp.lt.s32.totalorder %s4062_s21, 15  ;;  %4289 = vmatprep.subr.msk.mxu0 %vm1333_vm2, %v3873_v24  ;;  %v4983_v41 = vsel %vm1199_vm6, 1.0, %v4780_v23  ;;  %vm1201_vm7 = vcmp.ne.s32.totalorder %v1055_v42, 15 }
  0x1c   : > { %4259 = vmatprep.mubr.msk.f32.mxu0 %vm534_vm0, %v521_v3  ;;  %v505_v5 = vld [vmem:[%s4890_s3] sm:$0xff]  ;;  %v506_v6 = vld [vmem:[%s4890_s3 + $0x8] sm:$0xff]  ;;  %v507_v7 = vld [vmem:[%s4890_s3 + $0x10] sm:$0xff]  ;;  %v4989_v44 = vsel %vm1201_vm7, 1.0, %v4780_v23  ;;  %p503_p11 = scmp.eq.s32.totalorder %s4762_s30, 1  ;;  %s5684_s30 = scalar_lea.vmem %s5771_s9, %s3824_s10 }
  0x1d   : > { %4260 = vmatmul.mubr.msk.f32.vlgmr.msra.gmra.mrb[0].mxu0 %vm534_vm0, %v522_v4  ;;  %v508_v8 = vld [vmem:[%s4890_s3 + $0x18] sm:$0xff]  ;;  %v509_v9 = vld [vmem:[%s4890_s3 + $0x20] sm:$0xff]  ;;  %v510_v10 = vld [vmem:[%s4890_s3 + $0x28] sm:$0xff]  ;;  %s5816_s21 = smov (!%p4903_p9, %s4062_s21), 15 }
  0x1e   : > { %4262 = vmatprep.mubr.msk.f32.mxu0 %vm534_vm0, %v505_v5  ;;  %v511_v11 = vld [vmem:[%s4890_s3 + $0x30] sm:$0xff]  ;;  %v512_v12 = vld [vmem:[%s4890_s3 + $0x38] sm:$0xff]  ;;  %v513_v13 = vld [vmem:[%s4890_s3 + $0x40] sm:$0xff]  ;;  %s5818_s21 = smov (!%p4903_p9, %s5816_s21), 15  ;;  %4290 = vmatpush3.msk.msra.mxu0 %vm1333_vm2, %v3873_v24 }
  0x1f   : > { %v514_v14 = vld [vmem:[%s4890_s3 + $0x48] sm:$0xff]  ;;  %v515_v15 = vld [vmem:[%s4890_s3 + $0x50] sm:$0xff]  ;;  %s3829_s20 = sshll.u32 %s5818_s21, 1  ;;  %v516_v16 = vld [vmem:[%s4890_s3 + $0x58] sm:$0xff]  ;;  %4315 = vmatprep.subr.msk.mxu0 %vm1333_vm2, %v1266_v43 }
  0x20   : > { %s483_s24 = sadd.s32 %s3829_s20, %s4874_s22  ;;  %v517_v17 = vld [vmem:[%s4890_s3 + $0x60] sm:$0xff]  ;;  %v518_v18 = vld [vmem:[%s4890_s3 + $0x68] sm:$0xff]  ;;  %v519_v19 = vld [vmem:[%s4890_s3 + $0x70] sm:$0xff] }
  0x21   : > { %4263 = vmatmul.mubr.msk.f32.gmra.mrb[2].mxu0 %vm534_vm0, %v506_v6  ;;  %s3831_s25 = sshll.u32 %s483_s24, 3  ;;  %v520_v20 = vld [vmem:[%s4890_s3 + $0x78] sm:$0xff]  ;;  %v783_v6 = vadd.s32 16, %v4950_v26 }
  0x22   : > { %4265 = vmatprep.mubr.msk.f32.mxu0 %vm534_vm0, %v507_v7  ;;  %s485_s29 = scalar_lea.vmem %s5764_s2, %s3831_s25  ;;  %v782_v7 = vadd.s32 8, %v4950_v26 }
  0x23   : > { %v523_v21 = vld [vmem:[%s485_s29] sm:$0xff]  ;;  %v524_v22 = vld [vmem:[%s485_s29 + $0x8] sm:$0xff]  ;;  %s502_s24 = scalar_select %p501_p10, 0.0, 1.0 }
  0x24   : > { %s5198_s17 = scalar_select %p503_p11, 0.0, 1.0 }
  0x25   : > { %4266 = vmatmul.mubr.msk.f32.gmra.mrb[4].mxu0 %vm534_vm0, %v508_v8  ;;  %v821_v49 = vstv %s502_s24 }
  0x26   : > { %4268 = vmatprep.mubr.msk.f32.mxu0 %vm534_vm0, %v509_v9  ;;  %v785_v9 = vadd.s32 32, %v4950_v26 }
  0x28   : > { %v978_v24 = vand.u32 15, %v785_v9 }
  0x29   : > { %4269 = vmatmul.mubr.msk.f32.gmra.mrb[6].mxu0 %vm534_vm0, %v510_v10 }
  0x2a   : > { %4271 = vmatprep.mubr.msk.f32.mxu0 %vm534_vm0, %v511_v11  ;;  %vm1142_vm10 = vcmp.ne.s32.totalorder %v978_v24, 0 }
  0x2d   : > { %4272 = vmatmul.mubr.msk.f32.gmra.mrb[8].mxu0 %vm534_vm0, %v512_v12 }
  0x2e   : > { %4274 = vmatprep.mubr.msk.f32.mxu0 %vm534_vm0, %v513_v13 }
  0x31   : > { %4275 = vmatmul.mubr.msk.f32.gmra.mrb[10].mxu0 %vm534_vm0, %v514_v14 }
  0x32   : > { %4277 = vmatprep.mubr.msk.f32.mxu0 %vm534_vm0, %v515_v15  ;;  %v787_v15 = vadd.s32 48, %v4950_v26 }
  0x34   : > { %v992_v34 = vand.u32 15, %v787_v15 }
  0x35   : > { %4278 = vmatmul.mubr.msk.f32.gmra.mrb[12].mxu0 %vm534_vm0, %v516_v16  ;;  %v5020_v16 = vld [vmem:[%s5767_s5 + $0x8] sm:$0xf] }
  0x36   : > { %4280 = vmatprep.mubr.msk.f32.mxu0 %vm534_vm0, %v517_v17  ;;  %vm5051_vm11 = vcmp.ne.s32.totalorder %v992_v34, 0 }
  0x39   : > { %4281 = vmatmul.mubr.msk.f32.gmra.mrb[14].mxu0 %vm534_vm0, %v518_v18 }
  0x3a   : > { %4283 = vmatprep.mubr.msk.f32.mxu0 %vm534_vm0, %v519_v19 }
  0x3d   : > { %4284 = vmatmul.mubr.msk.f32.gmra.mrb[16].mxu0 %vm534_vm0, %v520_v20  ;;  %v964_v20 = vand.u32 15, %v783_v6 }
  0x3e   : > { %4286 = vmatprep.mubr.msk.f32.mxu0 %vm534_vm0, %v523_v21  ;;  %v957_v21 = vand.u32 15, %v782_v7 }
  0x3f   : > { %vm1140_vm8 = vcmp.ne.s32.totalorder %v964_v20, 0 }
  0x40   : > { %vm1187_vm9 = vcmp.ne.s32.totalorder %v957_v21, 15 }
  0x41   : > { %4287 = vmatmul.mubr.msk.f32.gmra.mrb[18].mxu0 %vm534_vm0, %v524_v22 }
  0xf0   : > { %v4261_v46 = vpop.f32.mrb[0].mxu0 }
  0xf1   : > { %v667_v47 = vadd.f32 %v4261_v46, %v4996_v45  ;;  %v661_v48 = vpop.f32.mrb[1].mxu0 }
  0xf2   : > { %v662_v50 = vadd.f32 %v4996_v45, %v661_v48 }
  0xf3   : > { %v761_v51 = vmax.f32 %v667_v47, 0.0  ;;  %v971_v47 = vand.u32 15, %v784_v27 }
  0xf4   : > { %v760_v52 = vmax.f32 %v662_v50, 0.0  ;;  %v4264_v53 = vpop.f32.mrb[2].mxu0 }
  0xf5   : > { %v904_v54 = vmul.f32 %v821_v49, %v761_v51  ;;  %v677_v55 = vadd.f32 %v4264_v53, %v4996_v45  ;;  %v671_v56 = vpop.f32.mrb[3].mxu0  ;;  %v5059_v53 = vsel %vm1187_vm9, 1.0, %v4780_v23  ;;  %vm5090_vm12 = vcmp.ne.s32.totalorder %v971_v47, 15 }
  0xf6   : > { %v903_v57 = vmul.f32 %v821_v49, %v760_v52  ;;  %v672_v58 = vadd.f32 %v4996_v45, %v671_v56  ;;  %v5056_v52 = vsel %vm1140_vm8, 1.0, %v4780_v23 }
  0xf7   : > { %927 = vst.msk [vmem:[#allocation2 + $0x10] sm:$0xff] %vm923_vm1, %v904_v54  ;;  %v763_v59 = vmax.f32 %v677_v55, 0.0 }
  0xf8   : > { %926 = vst.msk [vmem:[#allocation2 + $0x8] sm:$0xff] %vm923_vm1, %v903_v57  ;;  %v762_v60 = vmax.f32 %v672_v58, 0.0  ;;  %v4267_v61 = vpop.f32.mrb[4].mxu0  ;;  %v5068_v57 = vsel %vm1142_vm10, 1.0, %v4780_v23 }
  0xf9   : > { %929 = vst.msk [vmem:[#allocation2 + $0x20] sm:$0xff] %vm923_vm1, %v763_v59  ;;  %v687_v62 = vadd.f32 %v4267_v61, %v4996_v45  ;;  %v681_v63 = vpop.f32.mrb[5].mxu0  ;;  %v791_v59 = vadd.s32 80, %v4950_v26 }
  0xfa   : > { %928 = vst.msk [vmem:[#allocation2 + $0x18] sm:$0xff] %vm923_vm1, %v762_v60  ;;  %v682_v0 = vadd.f32 %v4996_v45, %v681_v63  ;;  %v985_v60 = vand.u32 15, %v786_v40 }
  0xfb   : > { %v765_v1 = vmax.f32 %v687_v62, 0.0  ;;  %v1020_v15 = vand.u32 15, %v791_v59 }
  0xfc   : > { %v764_v2 = vmax.f32 %v682_v0, 0.0  ;;  %v4270_v3 = vpop.f32.mrb[6].mxu0  ;;  %vm5119_vm13 = vcmp.ne.s32.totalorder %v985_v60, 15  ;;  %v795_v60 = vadd.s32 112, %v4950_v26 }
  0xfd   : > { %931 = vst.msk [vmem:[#allocation2 + $0x30] sm:$0xff] %vm923_vm1, %v765_v1  ;;  %v697_v4 = vadd.f32 %v4270_v3, %v4996_v45  ;;  %v691_v5 = vpop.f32.mrb[7].mxu0  ;;  %v5088_v3 = vsel %vm5051_vm11, 1.0, %v4780_v23  ;;  %v5158_v40 = vsel %vm5119_vm13, 1.0, %v4780_v23  ;;  %vm5179_vm15 = vcmp.ne.s32.totalorder %v1020_v15, 0 }
  0xfe   : > { %930 = vst.msk [vmem:[#allocation2 + $0x28] sm:$0xff] %vm923_vm1, %v764_v2  ;;  %v692_v8 = vadd.f32 %v4996_v45, %v691_v5  ;;  %v1268_v14 = vld [vmem:[#allocation2 + $0x10] sm:$0xff] }
  0xff   : > { %v767_v10 = vmax.f32 %v697_v4, 0.0  ;;  %v1267_v11 = vld [vmem:[#allocation2 + $0x8] sm:$0xff] }
 0x100   : > { %v766_v12 = vmax.f32 %v692_v8, 0.0  ;;  %v4273_v13 = vpop.f32.mrb[8].mxu0  ;;  %4291 = vmatprep.mubr.msk.f32.mxu0 %vm923_vm1, %v1267_v11  ;;  %v5035_v32 = vld [vmem:[#allocation2 + $0x20] sm:$0xff] }
 0x101   : > { %933 = vst.msk [vmem:[#allocation2 + $0x40] sm:$0xff] %vm923_vm1, %v767_v10  ;;  %v707_v17 = vadd.f32 %v4273_v13, %v4996_v45  ;;  %v701_v18 = vpop.f32.mrb[9].mxu0  ;;  %4292 = vmatmul.mubr.msk.f32.vlgmr.msra.gmra.mrb[20].mxu0 %vm923_vm1, %v1268_v14  ;;  %v5025_v19 = vld [vmem:[#allocation2 + $0x18] sm:$0xff]  ;;  %v5106_v10 = vld [vmem:[%s5767_s5 + $0x14] sm:$0xf] }
 0x102   : > { %932 = vst.msk [vmem:[#allocation2 + $0x38] sm:$0xff] %vm923_vm1, %v766_v12  ;;  %v702_v22 = vadd.f32 %v4996_v45, %v701_v18  ;;  %4294 = vmatprep.mubr.msk.f32.mxu0 %vm923_vm1, %v5025_v19  ;;  %4316 = vmatpush3.msk.msra.mxu0 %vm1333_vm2, %v1266_v43  ;;  %v789_v43 = vadd.s32 64, %v4950_v26 }
 0x103   : > { %v769_v25 = vmax.f32 %v707_v17, 0.0  ;;  %4341 = vmatprep.subr.msk.mxu0 %vm1333_vm2, %v5020_v16  ;;  %v793_v17 = vadd.s32 96, %v4950_v26 }
 0x104   : > { %v768_v29 = vmax.f32 %v702_v22, 0.0  ;;  %v4276_v30 = vpop.f32.mrb[10].mxu0  ;;  %v5049_v50 = vld [vmem:[#allocation2 + $0x30] sm:$0xff]  ;;  %v1006_v63 = vand.u32 15, %v789_v43 }
 0x105   : > { %935 = vst.msk [vmem:[#allocation2 + $0x50] sm:$0xff] %vm923_vm1, %v769_v25  ;;  %v717_v36 = vadd.f32 %v4276_v30, %v4996_v45  ;;  %v711_v37 = vpop.f32.mrb[11].mxu0  ;;  %4295 = vmatmul.mubr.msk.f32.gmra.mrb[22].mxu0 %vm923_vm1, %v5035_v32  ;;  %v5041_v39 = vld [vmem:[#allocation2 + $0x28] sm:$0xff] }
 0x106   : > { %934 = vst.msk [vmem:[#allocation2 + $0x48] sm:$0xff] %vm923_vm1, %v768_v29  ;;  %v712_v42 = vadd.f32 %v4996_v45, %v711_v37  ;;  %4297 = vmatprep.mubr.msk.f32.mxu0 %vm923_vm1, %v5041_v39  ;;  %vm5135_vm14 = vcmp.ne.s32.totalorder %v1006_v63, 0  ;;  %v950_v37 = vand.u32 15, %v4950_v26 }
 0x107   : > { %v771_v46 = vmax.f32 %v717_v36, 0.0 }
 0x108   : > { %v770_v48 = vmax.f32 %v712_v42, 0.0  ;;  %v4279_v49 = vpop.f32.mrb[12].mxu0  ;;  %v5099_v8 = vld [vmem:[#allocation2 + $0x40] sm:$0xff]  ;;  %vm5228_vm4 = vcmp.ne.s32.totalorder %v950_v37, 0 }
 0x109   : > { %937 = vst.msk [vmem:[#allocation2 + $0x60] sm:$0xff] %vm923_vm1, %v771_v46  ;;  %v727_v54 = vadd.f32 %v4279_v49, %v4996_v45  ;;  %v721_v55 = vpop.f32.mrb[13].mxu0  ;;  %4298 = vmatmul.mubr.msk.f32.gmra.mrb[24].mxu0 %vm923_vm1, %v5049_v50  ;;  %v5065_v56 = vld [vmem:[#allocation2 + $0x38] sm:$0xff] }
 0x10a   : > { %v5070_v58 = vld [vmem:[#allocation2 + $0x37] sm:$0xff]  ;;  %936 = vst.msk [vmem:[#allocation2 + $0x58] sm:$0xff] %vm923_vm1, %v770_v48  ;;  %v722_v61 = vadd.f32 %v4996_v45, %v721_v55  ;;  %4300 = vmatprep.mubr.msk.f32.mxu0 %vm923_vm1, %v5065_v56  ;;  %v5101_v9 = vld [vmem:[#allocation2 + $0x3f] sm:$0xff]  ;;  %v5175_v48 = vsel %vm5135_vm14, 1.0, %v4780_v23 }
 0x10b   : > { %v1944_v62 = vmul.f32 %v5068_v57, %v5070_v58  ;;  %v5079_v0 = vld [vmem:[#allocation2 + $0x31] sm:$0xff]  ;;  %v5083_v1 = vmul.f32 %v5056_v52, %v5070_v58  ;;  %v773_v2 = vmax.f32 %v727_v54, 0.0  ;;  %v1034_v54 = vand.u32 15, %v793_v17 }
 0x10c   : > { %v5096_v5 = vmul.f32 %v5059_v53, %v5079_v0  ;;  %v772_v6 = vmax.f32 %v722_v61, 0.0  ;;  %v4282_v7 = vpop.f32.mrb[14].mxu0  ;;  %v5150_v34 = vld [vmem:[#allocation2 + $0x50] sm:$0xff]  ;;  %v5220_v17 = vsel %vm5179_vm15, 1.0, %v4780_v23 }
 0x10d   : > { %4375 = vmatprep.mubr.msk.f32.mxu1 %vm923_vm1, %v1944_v62  ;;  %939 = vst.msk [vmem:[#allocation2 + $0x70] sm:$0xff] %vm923_vm1, %v773_v2  ;;  %v737_v11 = vadd.f32 %v4282_v7, %v4996_v45  ;;  %v5110_v12 = vld [vmem:[#allocation2 + $0x47] sm:$0xff]  ;;  %v731_v13 = vpop.f32.mrb[15].mxu0  ;;  %4301 = vmatmul.mubr.msk.f32.gmra.mrb[26].mxu0 %vm923_vm1, %v5099_v8  ;;  %v5152_v36 = vld [vmem:[#allocation2 + $0x4f] sm:$0xff]  ;;  %vm5224_vm3 = vcmp.ne.s32.totalorder %v1034_v54, 0 }
 0x10e   : > { %4376 = vmatmul.mubr.msk.f32.vlgmr.msra.gmra.mrb[0].mxu1 %vm923_vm1, %v5101_v9  ;;  %v5116_v14 = vld [vmem:[#allocation2 + $0x48] sm:$0xff]  ;;  %938 = vst.msk [vmem:[#allocation2 + $0x68] sm:$0xff] %vm923_vm1, %v772_v6  ;;  %v5126_v20 = vmul.f32 %v5068_v57, %v5110_v12  ;;  %v732_v21 = vadd.f32 %v4996_v45, %v731_v13  ;;  %v1946_v22 = vmul.f32 %v5088_v3, %v5110_v12 }
 0x10f   : > { %4394 = vmatpush3.msk.msra.mxu1 %vm1333_vm2, %v4969_v33  ;;  %4303 = vmatprep.mubr.msk.f32.mxu0 %vm923_vm1, %v5116_v14  ;;  %v5139_v25 = vld [vmem:[#allocation2 + $0x41] sm:$0xff]  ;;  %v775_v27 = vmax.f32 %v737_v11, 0.0  ;;  %v5147_v33 = vsel %vm5090_vm12, 1.0, %v4780_v23 }
 0x110   : > { %4419 = vmatprep.subr.msk.mxu1 %vm1333_vm2, %v5106_v10  ;;  %v774_v29 = vmax.f32 %v732_v21, 0.0  ;;  %v4285_v30 = vpop.f32.mrb[16].mxu0  ;;  %4378 = vmatprep.mubr.msk.f32.mxu1 %vm923_vm1, %v1946_v22  ;;  %v5162_v42 = vmul.f32 %v5147_v33, %v5139_v25  ;;  %v5205_v7 = vld [vmem:[#allocation2 + $0x60] sm:$0xff] }
 0x111   : > { %941 = vst.msk [vmem:[#allocation2 + $0x80] sm:$0xff] %vm923_vm1, %v775_v27  ;;  %v747_v43 = vadd.f32 %v4285_v30, %v4996_v45  ;;  %v741_v46 = vpop.f32.mrb[17].mxu0  ;;  %4304 = vmatmul.mubr.msk.f32.gmra.mrb[28].mxu0 %vm923_vm1, %v5150_v34  ;;  %v5170_v47 = vld [vmem:[#allocation2 + $0x58] sm:$0xff] }
 0x112   : > { %5783 = vst [vmem:[#allocation3_spill] sm:$0xff] %v5162_v42  ;;  %4379 = vmatmul.mubr.msk.f32.gmra.mrb[2].mxu1 %vm923_vm1, %v5152_v36  ;;  %v5177_v49 = vld [vmem:[#allocation2 + $0x57] sm:$0xff]  ;;  %940 = vst.msk [vmem:[#allocation2 + $0x78] sm:$0xff] %vm923_vm1, %v774_v29  ;;  %v742_v55 = vadd.f32 %v4996_v45, %v741_v46  ;;  %4306 = vmatprep.mubr.msk.f32.mxu0 %vm923_vm1, %v5170_v47  ;;  %v5207_v26 = vld [vmem:[#allocation2 + $0x5f] sm:$0xff]  ;;  %v1048_v29 = vand.u32 15, %v795_v60  ;;  %v862_v46 = vstv %s5198_s17 }
 0x113   : > { %v1948_v59 = vmul.f32 %v5175_v48, %v5177_v49  ;;  %v5190_v61 = vld [vmem:[#allocation2 + $0x51] sm:$0xff]  ;;  %v5194_v62 = vmul.f32 %v5088_v3, %v5177_v49  ;;  %v777_v63 = vmax.f32 %v747_v43, 0.0 }
 0x114   : > { %v5202_v2 = vmul.f32 %v5158_v40, %v5190_v61  ;;  %v776_v4 = vmax.f32 %v742_v55, 0.0  ;;  %v4288_v6 = vpop.f32.mrb[18].mxu0  ;;  %v5250_v54 = vld [vmem:[#allocation2 + $0x70] sm:$0xff]  ;;  %vm1152_vm5 = vcmp.ne.s32.totalorder %v1048_v29, 0 }
 0x115   : > { %4381 = vmatprep.mubr.msk.f32.mxu1 %vm923_vm1, %v1948_v59  ;;  %943 = vst.msk [vmem:[#allocation2 + $0x90] sm:$0xff] %vm923_vm1, %v777_v63  ;;  %v757_v11 = vadd.f32 %v4288_v6, %v4996_v45  ;;  %v751_v13 = vpop.f32.mrb[19].mxu0  ;;  %4307 = vmatmul.mubr.msk.f32.gmra.mrb[30].mxu0 %vm923_vm1, %v5205_v7  ;;  %v5215_v15 = vld [vmem:[#allocation2 + $0x68] sm:$0xff]  ;;  %v5263_v63 = vsel %vm5224_vm3, 1.0, %v4780_v23  ;;  %v5270_v6 = vsel %vm5228_vm4, 1.0, %v4780_v23 }
 0x116   : > { %5786 = vst [vmem:[#allocation4_spill] sm:$0xff] %v5202_v2  ;;  %4382 = vmatmul.mubr.msk.f32.gmra.mrb[4].mxu1 %vm923_vm1, %v5207_v26  ;;  %v5222_v18 = vld [vmem:[#allocation2 + $0x67] sm:$0xff]  ;;  %942 = vst.msk [vmem:[#allocation2 + $0x88] sm:$0xff] %vm923_vm1, %v776_v4  ;;  %v752_v24 = vadd.f32 %v4996_v45, %v751_v13  ;;  %4309 = vmatprep.mubr.msk.f32.mxu0 %vm923_vm1, %v5215_v15  ;;  %v5252_v55 = vld [vmem:[#allocation2 + $0x6f] sm:$0xff] }
 0x117   : > { %v1950_v27 = vmul.f32 %v5220_v17, %v5222_v18  ;;  %v5238_v30 = vld [vmem:[#allocation2 + $0x61] sm:$0xff]  ;;  %v5242_v43 = vmul.f32 %v5175_v48, %v5222_v18  ;;  %v779_v37 = vmax.f32 %v757_v11, 0.0 }
 0x118   : > { %v5247_v51 = vmul.f32 %v4964_v31, %v5238_v30  ;;  %v778_v45 = vmax.f32 %v752_v24, 0.0  ;;  %v1234_v11 = vld [vmem:[#allocation2 + $0x7] sm:$0xff] }
 0x119   : > { %4384 = vmatprep.mubr.msk.f32.mxu1 %vm923_vm1, %v1950_v27  ;;  %v922_v59 = vmul.f32 %v862_v46, %v779_v37  ;;  %4310 = vmatmul.mubr.msk.f32.gmra.mrb[32].mxu0 %vm923_vm1, %v5250_v54  ;;  %v5258_v60 = vld [vmem:[#allocation2 + $0x78] sm:$0xff]  ;;  %v5289_v37 = vld [vmem:[#allocation2 + $0x80] sm:$0xff]  ;;  %v1250_v29 = vmul.f32 %v5270_v6, %v1234_v11 }
 0x11a   : > { %5791 = vst [vmem:[#allocation5_spill] sm:$0xff] %v5247_v51  ;;  %4385 = vmatmul.mubr.msk.f32.gmra.mrb[6].mxu1 %vm923_vm1, %v5252_v55  ;;  %v5265_v4 = vld [vmem:[#allocation2 + $0x77] sm:$0xff]  ;;  %v921_v13 = vmul.f32 %v862_v46, %v778_v45  ;;  %4312 = vmatprep.mubr.msk.f32.mxu0 %vm923_vm1, %v5258_v60  ;;  %v5291_v46 = vld [vmem:[#allocation2 + $0x7f] sm:$0xff]  ;;  %v5299_v45 = vsel %vm1152_vm5, 1.0, %v4780_v23  ;;  %v1235_v23 = vld [vmem:[#allocation2 + $0xf] sm:$0xff] }
 0x11b   : > { %v1952_v24 = vmul.f32 %v5263_v63, %v5265_v4  ;;  %v5276_v27 = vld [vmem:[#allocation2 + $0x71] sm:$0xff]  ;;  %v5280_v21 = vmul.f32 %v5220_v17, %v5265_v4  ;;  %945 = vst.msk [vmem:[#allocation2 + $0xa0] sm:$0xff] %vm923_vm1, %v922_v59 }
 0x11c   : > { %v5285_v22 = vmul.f32 %v4975_v35, %v5276_v27  ;;  %944 = vst.msk [vmem:[#allocation2 + $0x98] sm:$0xff] %vm923_vm1, %v921_v13 }
 0x11d   : > { %4387 = vmatprep.mubr.msk.f32.mxu1 %vm923_vm1, %v1952_v24  ;;  %4313 = vmatmul.mubr.msk.f32.gmra.mrb[34].mxu0 %vm923_vm1, %v5289_v37  ;;  %v1938_v59 = vld [vmem:[#allocation2 + $0x87] sm:$0xff]  ;;  %v5315_v2 = vld [vmem:[#allocation2 + $0x8f] sm:$0xff] }
 0x11e   : > { %5792 = vst [vmem:[#allocation6_spill] sm:$0xff] %v5285_v22  ;;  %4388 = vmatmul.mubr.msk.f32.gmra.mrb[8].mxu1 %vm923_vm1, %v5291_v46  ;;  %v5301_v22 = vld [vmem:[#allocation2 + $0x17] sm:$0xff]  ;;  %4317 = vmatprep.mubr.msk.f32.mxu0 %vm923_vm1, %v1250_v29  ;;  %v1954_v13 = vmul.f32 %v5299_v45, %v1938_v59  ;;  %v5305_v24 = vld [vmem:[#allocation2 + $0x81] sm:$0xff]  ;;  %v5308_v11 = vmul.f32 %v5263_v63, %v1938_v59 }
 0x11f   : > { %v5312_v51 = vmul.f32 %v4979_v38, %v5305_v24  ;;  %v1252_v42 = vmul.f32 %v5056_v52, %v5301_v22  ;;  %v5319_v29 = vld [vmem:[#allocation2 + $0x27] sm:$0xff] }
 0x120   : > { %4390 = vmatprep.mubr.msk.f32.mxu1 %vm923_vm1, %v1954_v13  ;;  %v1254_v13 = vmul.f32 %v5068_v57, %v5319_v29  ;;  %v1256_v57 = vmul.f32 %v5088_v3, %v5070_v58  ;;  %v1260_v58 = vmul.f32 %v5220_v17, %v5177_v49  ;;  %v1262_v3 = vmul.f32 %v5263_v63, %v5222_v18  ;;  %v5411_v17 = vld [vmem:[#allocation2 + $0x90] sm:$0xff]  ;;  %v1681_v18 = vld [vmem:[#allocation2 + $0x21] sm:$0xff]  ;;  %v1680_v63 = vld [vmem:[#allocation2 + $0x19] sm:$0xff] }
 0x121   : > { %5793 = vst [vmem:[#allocation7_spill] sm:$0xff] %v5312_v51  ;;  %4318 = vmatmul.mubr.msk.f32.vlgmr.msra.gmra.mrb[20].mxu0 %vm923_vm1, %v1235_v23  ;;  %v5333_v51 = vld [vmem:[#allocation2 + $0x1f] sm:$0xff]  ;;  %v3980_v23 = vld [vmem:[%s5767_s5 + $0x18] sm:$0xf] }
 0x122   : > { %4391 = vmatmul.mubr.msk.f32.gmra.mrb[10].mxu1 %vm923_vm1, %v5315_v2  ;;  %4320 = vmatprep.mubr.msk.f32.mxu0 %vm923_vm1, %v1252_v42  ;;  %v1678_v42 = vld [vmem:[#allocation2 + $0x9] sm:$0xff] }
 0x123   : > { %4395 = vmatprep.mubr.msk.f32.mxu1 %vm923_vm1, %v5025_v19  ;;  %4342 = vmatpush3.msk.msra.mxu0 %vm1333_vm2, %v5020_v16  ;;  %v5329_v59 = vld [vmem:[#allocation2 + $0x91] sm:$0xff] }
 0x124   : > { %4367 = vmatprep.subr.msk.mxu0 %vm1333_vm2, %v4956_v28  ;;  %v5342_v19 = vmul.f32 %v4983_v41, %v5329_v59  ;;  %v5354_v16 = vld [vmem:[#allocation2 + $0x2f] sm:$0xff] }
 0x125   : > { %4321 = vmatmul.mubr.msk.f32.gmra.mrb[22].mxu0 %vm923_vm1, %v5333_v51 }
 0x126   : > { %4396 = vmatmul.mubr.msk.f32.vlgmr.msra.gmra.mrb[12].mxu1 %vm923_vm1, %v5035_v32  ;;  %4323 = vmatprep.mubr.msk.f32.mxu0 %vm923_vm1, %v1254_v13  ;;  %v1258_v32 = vmul.f32 %v5175_v48, %v5110_v12  ;;  %v1679_v12 = vld [vmem:[#allocation2 + $0x11] sm:$0xff]  ;;  %v5405_v48 = vld [vmem:[#allocation2 + $0x88] sm:$0xff]  ;;  %v2417_v13 = vmul.f32 %v5059_v53, %v1681_v18 }
 0x127   : > { %4420 = vmatpush3.msk.msra.mxu1 %vm1333_vm2, %v5106_v10  ;;  %4398 = vmatprep.mubr.msk.f32.mxu1 %vm923_vm1, %v5041_v39  ;;  %v1264_v10 = vmul.f32 %v5299_v45, %v5265_v4  ;;  %v1695_v49 = vmul.f32 %v5059_v53, %v1679_v12  ;;  %v1697_v4 = vmul.f32 %v5147_v33, %v1681_v18 }
 0x128   : > { %4445 = vmatprep.subr.msk.mxu1 %vm1333_vm2, %v3980_v23  ;;  %v2419_v53 = vmul.f32 %v5147_v33, %v5079_v0  ;;  %v5453_v33 = vld [vmem:[#allocation2 + $0x49] sm:$0xff]  ;;  %v2425_v12 = vmul.f32 %v4975_v35, %v5238_v30  ;;  %v2431_v18 = vmul.f32 %v4989_v44, %v5329_v59  ;;  %v5633_v59 = vld [vmem:[%s5768_s6] ss:$0 sm:$0xff] }
 0x129   : > { %4324 = vmatmul.mubr.msk.f32.gmra.mrb[24].mxu0 %vm923_vm1, %v5354_v16 }
 0x12a   : > { %4399 = vmatmul.mubr.msk.f32.gmra.mrb[14].mxu1 %vm923_vm1, %v5049_v50  ;;  %4326 = vmatprep.mubr.msk.f32.mxu0 %vm923_vm1, %v1256_v57  ;;  %v3998_v57 = vld [vmem:[%s5767_s5 + $0x1c] sm:$0xf] }
 0x12b   : > { %4401 = vmatprep.mubr.msk.f32.mxu1 %vm923_vm1, %v5065_v56 }
 0x12d   : > { %4327 = vmatmul.mubr.msk.f32.gmra.mrb[26].mxu0 %vm923_vm1, %v5101_v9 }
 0x12e   : > { %4402 = vmatmul.mubr.msk.f32.gmra.mrb[0].mxu1 %vm923_vm1, %v5099_v8  ;;  %4329 = vmatprep.mubr.msk.f32.mxu0 %vm923_vm1, %v1258_v32  ;;  %v5427_v32 = vld [vmem:[#allocation2 + $0x29] sm:$0xff] }
 0x12f   : > { %4404 = vmatprep.mubr.msk.f32.mxu1 %vm923_vm1, %v5116_v14 }
 0x131   : > { %4330 = vmatmul.mubr.msk.f32.gmra.mrb[28].mxu0 %vm923_vm1, %v5152_v36 }
 0x132   : > { %4405 = vmatmul.mubr.msk.f32.gmra.mrb[2].mxu1 %vm923_vm1, %v5150_v34  ;;  %4332 = vmatprep.mubr.msk.f32.mxu0 %vm923_vm1, %v1260_v58  ;;  %v5441_v58 = vld [vmem:[#allocation2 + $0x39] sm:$0xff] }
 0x133   : > { %4407 = vmatprep.mubr.msk.f32.mxu1 %vm923_vm1, %v5170_v47 }
 0x135   : > { %4333 = vmatmul.mubr.msk.f32.gmra.mrb[30].mxu0 %vm923_vm1, %v5207_v26 }
 0x136   : > { %4408 = vmatmul.mubr.msk.f32.gmra.mrb[4].mxu1 %vm923_vm1, %v5205_v7  ;;  %4335 = vmatprep.mubr.msk.f32.mxu0 %vm923_vm1, %v1262_v3  ;;  %v1703_v3 = vmul.f32 %v4975_v35, %v5190_v61  ;;  %v5489_v35 = vld [vmem:[#allocation2 + $0x79] sm:$0xff] }
 0x137   : > { %4410 = vmatprep.mubr.msk.f32.mxu1 %vm923_vm1, %v5215_v15 }
 0x139   : > { %4336 = vmatmul.mubr.msk.f32.gmra.mrb[32].mxu0 %vm923_vm1, %v5252_v55 }
 0x13a   : > { %4411 = vmatmul.mubr.msk.f32.gmra.mrb[6].mxu1 %vm923_vm1, %v5250_v54  ;;  %4338 = vmatprep.mubr.msk.f32.mxu0 %vm923_vm1, %v1264_v10  ;;  %v2423_v10 = vmul.f32 %v4964_v31, %v5190_v61  ;;  %v1707_v61 = vmul.f32 %v4983_v41, %v5276_v27 }
 0x13b   : > { %4413 = vmatprep.mubr.msk.f32.mxu1 %vm923_vm1, %v5258_v60 }
 0x13d   : > { %4339 = vmatmul.mubr.msk.f32.gmra.mrb[34].mxu0 %vm923_vm1, %v5291_v46 }
 0x13e   : > { %4414 = vmatmul.mubr.msk.f32.gmra.mrb[8].mxu1 %vm923_vm1, %v5289_v37  ;;  %4343 = vmatprep.mubr.msk.f32.mxu0 %vm923_vm1, %v1678_v42  ;;  %v2427_v42 = vmul.f32 %v4979_v38, %v5276_v27  ;;  %v5503_v27 = vld [vmem:[#allocation2 + $0x89] sm:$0xff] }
 0x13f   : > { %4416 = vmatprep.mubr.msk.f32.mxu1 %vm923_vm1, %v5405_v48 }
 0x141   : > { %4344 = vmatmul.mubr.msk.f32.vlgmr.msra.gmra.mrb[20].mxu0 %vm923_vm1, %v1695_v49  ;;  %v2429_v49 = vmul.f32 %v4983_v41, %v5305_v24  ;;  %v1942_v41 = vmul.f32 %v5056_v52, %v5319_v29  ;;  %v2660_v52 = vld [vmem:[#allocation2 + $0x97] sm:$0xff] }
 0x142   : > { %4417 = vmatmul.mubr.msk.f32.gmra.mrb[10].mxu1 %vm923_vm1, %v5411_v17  ;;  %4346 = vmatprep.mubr.msk.f32.mxu0 %vm923_vm1, %v1680_v63 }
 0x143   : > { %4421 = vmatprep.mubr.msk.f32.mxu1 %vm923_vm1, %v1680_v63  ;;  %4368 = vmatpush3.msk.msra.mxu0 %vm1333_vm2, %v4956_v28  ;;  %v1699_v28 = vmul.f32 %v5158_v40, %v5079_v0  ;;  %v2421_v0 = vmul.f32 %v5158_v40, %v5139_v25  ;;  %v1705_v40 = vmul.f32 %v4979_v38, %v5238_v30 }
 0x144   : > { %v1709_v30 = vmul.f32 %v4989_v44, %v5305_v24  ;;  %v1940_v38 = vmul.f32 %v5270_v6, %v5301_v22  ;;  %v2662_v22 = vmul.f32 %v5270_v6, %v5319_v29  ;;  %v4016_v24 = vld [vmem:[%s5767_s5 + $0x20] sm:$0xf] }
 0x145   : > { %4347 = vmatmul.mubr.msk.f32.gmra.mrb[22].mxu0 %vm923_vm1, %v1697_v4 }
 0x146   : > { %4422 = vmatmul.mubr.msk.f32.vlgmr.msra.gmra.mrb[12].mxu1 %vm923_vm1, %v2417_v13  ;;  %4349 = vmatprep.mubr.msk.f32.mxu0 %vm923_vm1, %v5427_v32 }
 0x147   : > { %4446 = vmatpush3.msk.msra.mxu1 %vm1333_vm2, %v3980_v23  ;;  %4424 = vmatprep.mubr.msk.f32.mxu1 %vm923_vm1, %v5427_v32  ;;  %v1701_v23 = vmul.f32 %v4964_v31, %v5139_v25  ;;  %v5465_v25 = vld [vmem:[#allocation2 + $0x59] sm:$0xff]  ;;  %v5477_v31 = vld [vmem:[#allocation2 + $0x69] sm:$0xff] }
 0x148   : > { %4471 = vmatprep.subr.msk.mxu1 %vm1333_vm2, %v3998_v57 }
 0x149   : > { %4350 = vmatmul.mubr.msk.f32.gmra.mrb[24].mxu0 %vm923_vm1, %v1699_v28 }
 0x14a   : > { %4425 = vmatmul.mubr.msk.f32.gmra.mrb[14].mxu1 %vm923_vm1, %v2419_v53  ;;  %4352 = vmatprep.mubr.msk.f32.mxu0 %vm923_vm1, %v5441_v58 }
 0x14b   : > { %4427 = vmatprep.mubr.msk.f32.mxu1 %vm923_vm1, %v5441_v58 }
 0x14d   : > { %4353 = vmatmul.mubr.msk.f32.gmra.mrb[26].mxu0 %vm923_vm1, %v1701_v23 }
 0x14e   : > { %4428 = vmatmul.mubr.msk.f32.gmra.mrb[0].mxu1 %vm923_vm1, %v2421_v0  ;;  %4355 = vmatprep.mubr.msk.f32.mxu0 %vm923_vm1, %v5453_v33 }
 0x14f   : > { %4430 = vmatprep.mubr.msk.f32.mxu1 %vm923_vm1, %v5453_v33 }
 0x151   : > { %4356 = vmatmul.mubr.msk.f32.gmra.mrb[28].mxu0 %vm923_vm1, %v1703_v3 }
 0x152   : > { %4431 = vmatmul.mubr.msk.f32.gmra.mrb[2].mxu1 %vm923_vm1, %v2423_v10  ;;  %4358 = vmatprep.mubr.msk.f32.mxu0 %vm923_vm1, %v5465_v25 }
 0x153   : > { %4433 = vmatprep.mubr.msk.f32.mxu1 %vm923_vm1, %v5465_v25 }
 0x155   : > { %4359 = vmatmul.mubr.msk.f32.gmra.mrb[30].mxu0 %vm923_vm1, %v1705_v40 }
 0x156   : > { %4434 = vmatmul.mubr.msk.f32.gmra.mrb[4].mxu1 %vm923_vm1, %v2425_v12  ;;  %4361 = vmatprep.mubr.msk.f32.mxu0 %vm923_vm1, %v5477_v31 }
 0x157   : > { %4436 = vmatprep.mubr.msk.f32.mxu1 %vm923_vm1, %v5477_v31 }
 0x159   : > { %4362 = vmatmul.mubr.msk.f32.gmra.mrb[32].mxu0 %vm923_vm1, %v1707_v61 }
 0x15a   : > { %4437 = vmatmul.mubr.msk.f32.gmra.mrb[6].mxu1 %vm923_vm1, %v2427_v42  ;;  %4364 = vmatprep.mubr.msk.f32.mxu0 %vm923_vm1, %v5489_v35 }
 0x15b   : > { %4439 = vmatprep.mubr.msk.f32.mxu1 %vm923_vm1, %v5489_v35 }
 0x15d   : > { %4365 = vmatmul.mubr.msk.f32.gmra.mrb[34].mxu0 %vm923_vm1, %v1709_v30 }
 0x15e   : > { %4440 = vmatmul.mubr.msk.f32.gmra.mrb[8].mxu1 %vm923_vm1, %v2429_v49  ;;  %4369 = vmatprep.mubr.msk.f32.mxu0 %vm923_vm1, %v1940_v38 }
 0x15f   : > { %4442 = vmatprep.mubr.msk.f32.mxu1 %vm923_vm1, %v5503_v27 }
 0x161   : > { %4370 = vmatmul.mubr.msk.f32.vlgmr.msra.gmra.mrb[20].mxu0 %vm923_vm1, %v5333_v51 }
 0x162   : > { %4443 = vmatmul.mubr.msk.f32.gmra.mrb[10].mxu1 %vm923_vm1, %v2431_v18  ;;  %4372 = vmatprep.mubr.msk.f32.mxu0 %vm923_vm1, %v1942_v41 }
 0x163   : > { %4447 = vmatprep.mubr.msk.f32.mxu1 %vm923_vm1, %v2662_v22 }
 0x165   : > { %4373 = vmatmul.mubr.msk.f32.gmra.mrb[22].mxu0 %vm923_vm1, %v5354_v16 }
 0x166   : > { %4448 = vmatmul.mubr.msk.f32.vlgmr.msra.gmra.mrb[12].mxu1 %vm923_vm1, %v5354_v16 }
 0x167   : > { %4472 = vmatpush3.msk.msra.mxu1 %vm1333_vm2, %v3998_v57  ;;  %4450 = vmatprep.mubr.msk.f32.mxu1 %vm923_vm1, %v5083_v1  ;;  %v2676_v1 = vmul.f32 %v5299_v45, %v2660_v52 }
 0x168   : > { %4497 = vmatprep.subr.msk.mxu1 %vm1333_vm2, %v4016_v24 }
 0x16a   : > { %4451 = vmatmul.mubr.msk.f32.gmra.mrb[14].mxu1 %vm923_vm1, %v5101_v9  ;;  %v2661_v9 = vld [vmem:[#allocation2 + $0x9f] sm:$0xff] }
 0x16b   : > { %4453 = vmatprep.mubr.msk.f32.mxu1 %vm923_vm1, %v5126_v20  ;;  %v5798_v20 = vld [vmem:[#allocation7_spill] sm:$0xff] }
 0x16e   : > { %4454 = vmatmul.mubr.msk.f32.gmra.mrb[0].mxu1 %vm923_vm1, %v5152_v36  ;;  %v3136_v36 = vld [vmem:[#allocation2 + $0x99] sm:$0xff] }
 0x16f   : > { %4456 = vmatprep.mubr.msk.f32.mxu1 %vm923_vm1, %v5194_v62  ;;  %v3407_v62 = vld [vmem:[%s5769_s7] sm:$0xf] }
 0x170   : > { %4523 = vmatprep.subr.msk.mxu0 %vm1333_vm2, %v3407_v62 }
 0x171   : > { %4524 = vmatpush3.msk.msra.mxu0 %vm1333_vm2, %v3407_v62 }
 0x172   : > { %4457 = vmatmul.mubr.msk.f32.gmra.mrb[2].mxu1 %vm923_vm1, %v5207_v26 }
 0x173   : > { %4459 = vmatprep.mubr.msk.f32.mxu1 %vm923_vm1, %v5242_v43 }
 0x176   : > { %4460 = vmatmul.mubr.msk.f32.gmra.mrb[4].mxu1 %vm923_vm1, %v5252_v55 }
 0x177   : > { %4462 = vmatprep.mubr.msk.f32.mxu1 %vm923_vm1, %v5280_v21 }
 0x17a   : > { %4463 = vmatmul.mubr.msk.f32.gmra.mrb[6].mxu1 %vm923_vm1, %v5291_v46 }
 0x17b   : > { %4465 = vmatprep.mubr.msk.f32.mxu1 %vm923_vm1, %v5308_v11 }
 0x17e   : > { %4466 = vmatmul.mubr.msk.f32.gmra.mrb[8].mxu1 %vm923_vm1, %v5315_v2 }
 0x17f   : > { %4468 = vmatprep.mubr.msk.f32.mxu1 %vm923_vm1, %v2676_v1 }
 0x182   : > { %4469 = vmatmul.mubr.msk.f32.gmra.mrb[10].mxu1 %vm923_vm1, %v2661_v9 }
 0x183   : > { %4473 = vmatprep.mubr.msk.f32.mxu1 %vm923_vm1, %v5041_v39  ;;  %v2906_v39 = vld [vmem:[#allocation2 + $0x98] sm:$0xff] }
 0x186   : > { %4474 = vmatmul.mubr.msk.f32.vlgmr.msra.gmra.mrb[12].mxu1 %vm923_vm1, %v5049_v50  ;;  %v2907_v50 = vld [vmem:[#allocation2 + $0xa0] sm:$0xff] }
 0x187   : > { %4498 = vmatpush3.msk.msra.mxu1 %vm1333_vm2, %v4016_v24  ;;  %4476 = vmatprep.mubr.msk.f32.mxu1 %vm923_vm1, %v5065_v56  ;;  %v5794_v56 = vld [vmem:[#allocation3_spill] sm:$0xff] }
 0x18a   : > { %4477 = vmatmul.mubr.msk.f32.gmra.mrb[14].mxu1 %vm923_vm1, %v5099_v8  ;;  %v5795_v8 = vld [vmem:[#allocation4_spill] sm:$0xff] }
 0x18b   : > { %4479 = vmatprep.mubr.msk.f32.mxu1 %vm923_vm1, %v5116_v14  ;;  %v5796_v14 = vld [vmem:[#allocation5_spill] sm:$0xff] }
 0x18e   : > { %4480 = vmatmul.mubr.msk.f32.gmra.mrb[0].mxu1 %vm923_vm1, %v5150_v34  ;;  %v3137_v34 = vld [vmem:[#allocation2 + $0xa1] sm:$0xff] }
 0x18f   : > { %4482 = vmatprep.mubr.msk.f32.mxu1 %vm923_vm1, %v5170_v47  ;;  %v3153_v47 = vmul.f32 %v4989_v44, %v3137_v34 }
 0x192   : > { %4483 = vmatmul.mubr.msk.f32.gmra.mrb[2].mxu1 %vm923_vm1, %v5205_v7 }
 0x193   : > { %4485 = vmatprep.mubr.msk.f32.mxu1 %vm923_vm1, %v5215_v15 }
 0x196   : > { %4486 = vmatmul.mubr.msk.f32.gmra.mrb[4].mxu1 %vm923_vm1, %v5250_v54 }
 0x197   : > { %4488 = vmatprep.mubr.msk.f32.mxu1 %vm923_vm1, %v5258_v60 }
 0x19a   : > { %4489 = vmatmul.mubr.msk.f32.gmra.mrb[6].mxu1 %vm923_vm1, %v5289_v37 }
 0x19b   : > { %4491 = vmatprep.mubr.msk.f32.mxu1 %vm923_vm1, %v5405_v48 }
 0x19e   : > { %4492 = vmatmul.mubr.msk.f32.gmra.mrb[8].mxu1 %vm923_vm1, %v5411_v17 }
 0x19f   : > { %4494 = vmatprep.mubr.msk.f32.mxu1 %vm923_vm1, %v2906_v39 }
 0x1a2   : > { %4495 = vmatmul.mubr.msk.f32.gmra.mrb[10].mxu1 %vm923_vm1, %v2907_v50 }
 0x1a3   : > { %4499 = vmatprep.mubr.msk.f32.mxu1 %vm923_vm1, %v5427_v32 }
 0x1a6   : > { %4500 = vmatmul.mubr.msk.f32.vlgmr.msra.gmra.mrb[12].mxu1 %vm923_vm1, %v5096_v5  ;;  %v5797_v5 = vld [vmem:[#allocation6_spill] sm:$0xff] }
 0x1a7   : > { %4502 = vmatprep.mubr.msk.f32.mxu1 %vm923_vm1, %v5441_v58 }
 0x1aa   : > { %4503 = vmatmul.mubr.msk.f32.gmra.mrb[14].mxu1 %vm923_vm1, %v5794_v56 }
 0x1ab   : > { %4505 = vmatprep.mubr.msk.f32.mxu1 %vm923_vm1, %v5453_v33 }
 0x1ae   : > { %4506 = vmatmul.mubr.msk.f32.gmra.mrb[0].mxu1 %vm923_vm1, %v5795_v8 }
 0x1af   : > { %4508 = vmatprep.mubr.msk.f32.mxu1 %vm923_vm1, %v5465_v25 }
 0x1b2   : > { %4509 = vmatmul.mubr.msk.f32.gmra.mrb[2].mxu1 %vm923_vm1, %v5796_v14 }
 0x1b3   : > { %4511 = vmatprep.mubr.msk.f32.mxu1 %vm923_vm1, %v5477_v31 }
 0x1b6   : > { %4512 = vmatmul.mubr.msk.f32.gmra.mrb[4].mxu1 %vm923_vm1, %v5797_v5 }
 0x1b7   : > { %4514 = vmatprep.mubr.msk.f32.mxu1 %vm923_vm1, %v5489_v35 }
 0x1ba   : > { %4515 = vmatmul.mubr.msk.f32.gmra.mrb[6].mxu1 %vm923_vm1, %v5798_v20 }
 0x1bb   : > { %4517 = vmatprep.mubr.msk.f32.mxu1 %vm923_vm1, %v5503_v27 }
 0x1be   : > { %4518 = vmatmul.mubr.msk.f32.gmra.mrb[8].mxu1 %vm923_vm1, %v5342_v19 }
 0x1bf   : > { %4520 = vmatprep.mubr.msk.f32.mxu1 %vm923_vm1, %v3136_v36 }
 0x1c2   : > { %4521 = vmatmul.mubr.msk.f32.gmra.mrb[10].mxu1 %vm923_vm1, %v3153_v47 }
 0x21c   : > { %v4351_v2 = vpop.f32.mrb[24].mxu0 }
 0x21d   : > { %v1849_v7 = vpop.f32.mrb[25].mxu0 }
 0x220   : > { %v4354_v26 = vpop.f32.mrb[26].mxu0 }
 0x221   : > { %v1859_v15 = vpop.f32.mrb[27].mxu0 }
 0x224   : > { %v4357_v43 = vpop.f32.mrb[28].mxu0 }
 0x225   : > { %v1869_v51 = vpop.f32.mrb[29].mxu0 }
 0x228   : > { %v4360_v54 = vpop.f32.mrb[30].mxu0 }
 0x229   : > { %v1879_v55 = vpop.f32.mrb[31].mxu0 }
 0x22c   : > { %v5622_v60 = vpop.f32.mrb[32].mxu0 }
 0x22d   : > { %v5624_v44 = vpop.f32.mrb[33].mxu0 }
 0x230   : > { %v5626_v6 = vpop.f32.mrb[34].mxu0 }
 0x231   : > { %v5628_v21 = vpop.f32.mrb[35].mxu0 }
 0x234   : > { %v4371_v37 = vpop.f32.mrb[20].mxu0 }
 0x235   : > { %v2075_v46 = vpop.f32.mrb[21].mxu0 }
 0x238   : > { %v4374_v45 = vpop.f32.mrb[22].mxu0 }
 0x239   : > { %v2085_v11 = vpop.f32.mrb[23].mxu0 }
 0x279   : > { %v4501_v29 = vpop.f32.mrb[12].mxu1 }
 0x27a   : > { %v4555_v19 = vadd.f32 %v4501_v29, %v4371_v37  ;;  %v3273_v16 = vpop.f32.mrb[13].mxu1 }
 0x27b   : > { %v4556_v48 = vadd.f32 %v3273_v16, %v2075_v46 }
 0x27c   : > { %v3376_v17 = vadd.f32 %v4555_v19, %v5633_v59 }
 0x27d   : > { %v3375_v63 = vadd.f32 %v4556_v48, %v5633_v59  ;;  %v4504_v4 = vpop.f32.mrb[14].mxu1 }
 0x27e   : > { %v4557_v13 = vadd.f32 %v4504_v4, %v4374_v45  ;;  %v3283_v57 = vpop.f32.mrb[15].mxu1  ;;  %v3392_v53 = vmax.f32 %v3376_v17, 0.0 }
 0x27f   : > { %v3391_v32 = vmax.f32 %v3375_v63, 0.0  ;;  %v4558_v28 = vadd.f32 %v3283_v57, %v2085_v11  ;;  %v4724_v63 = vld [vmem:[%s4890_s3 + $0x8] sm:$0xff] }
 0x280   : > { %v3378_v58 = vadd.f32 %v4557_v13, %v5633_v59  ;;  %v4725_v13 = vld [vmem:[%s4890_s3] sm:$0xff] }
 0x281   : > { %v3377_v23 = vadd.f32 %v4558_v28, %v5633_v59  ;;  %v4507_v0 = vpop.f32.mrb[0].mxu1  ;;  %4525 = vmatprep.mubr.msk.f32.mxu0 %vm923_vm1, %v3391_v32 }
 0x282   : > { %v4559_v33 = vadd.f32 %v4507_v0, %v4351_v2  ;;  %v3293_v3 = vpop.f32.mrb[1].mxu1  ;;  %4526 = vmatmul.mubr.msk.f32.vlgmr.msra.gmra.mrb[36].mxu0 %vm923_vm1, %v3392_v53  ;;  %v3394_v40 = vmax.f32 %v3378_v58, 0.0 }
 0x283   : > { %v3393_v10 = vmax.f32 %v3377_v23, 0.0  ;;  %v4560_v25 = vadd.f32 %v3293_v3, %v1849_v7 }
 0x284   : > { %v3380_v12 = vadd.f32 %v4559_v33, %v5633_v59  ;;  %v4726_v33 = vld [vmem:[%s4890_s3 + $0x18] sm:$0xff] }
 0x285   : > { %v3379_v31 = vadd.f32 %v4560_v25, %v5633_v59  ;;  %v4510_v61 = vpop.f32.mrb[2].mxu1  ;;  %4528 = vmatprep.mubr.msk.f32.mxu0 %vm923_vm1, %v3393_v10  ;;  %v4727_v10 = vld [vmem:[%s4890_s3 + $0x10] sm:$0xff] }
 0x286   : > { %v4561_v42 = vadd.f32 %v4510_v61, %v4354_v26  ;;  %v3303_v35 = vpop.f32.mrb[3].mxu1  ;;  %4529 = vmatmul.mubr.msk.f32.gmra.mrb[38].mxu0 %vm923_vm1, %v3394_v40  ;;  %v3396_v38 = vmax.f32 %v3380_v12, 0.0 }
 0x287   : > { %v3395_v30 = vmax.f32 %v3379_v31, 0.0  ;;  %v4562_v49 = vadd.f32 %v3303_v35, %v1859_v15 }
 0x288   : > { %v3382_v27 = vadd.f32 %v4561_v42, %v5633_v59 }
 0x289   : > { %v3381_v18 = vadd.f32 %v4562_v49, %v5633_v59  ;;  %v4513_v41 = vpop.f32.mrb[4].mxu1  ;;  %4531 = vmatprep.mubr.msk.f32.mxu0 %vm923_vm1, %v3395_v30  ;;  %v4728_v30 = vld [vmem:[%s4890_s3 + $0x28] sm:$0xff] }
 0x28a   : > { %v4563_v22 = vadd.f32 %v4513_v41, %v4357_v43  ;;  %v3313_v24 = vpop.f32.mrb[5].mxu1  ;;  %4532 = vmatmul.mubr.msk.f32.gmra.mrb[40].mxu0 %vm923_vm1, %v3396_v38  ;;  %v3398_v9 = vmax.f32 %v3382_v27, 0.0  ;;  %v4729_v38 = vld [vmem:[%s4890_s3 + $0x20] sm:$0xff] }
 0x28b   : > { %v3397_v52 = vmax.f32 %v3381_v18, 0.0  ;;  %v4564_v1 = vadd.f32 %v3313_v24, %v1869_v51 }
 0x28c   : > { %v3384_v39 = vadd.f32 %v4563_v22, %v5633_v59 }
 0x28d   : > { %v3383_v50 = vadd.f32 %v4564_v1, %v5633_v59  ;;  %v4516_v56 = vpop.f32.mrb[6].mxu1  ;;  %4534 = vmatprep.mubr.msk.f32.mxu0 %vm923_vm1, %v3397_v52 }
 0x28e   : > { %v4565_v8 = vadd.f32 %v4516_v56, %v4360_v54  ;;  %v3323_v14 = vpop.f32.mrb[7].mxu1  ;;  %4535 = vmatmul.mubr.msk.f32.gmra.mrb[42].mxu0 %vm923_vm1, %v3398_v9  ;;  %v3400_v34 = vmax.f32 %v3384_v39, 0.0  ;;  %v4730_v9 = vld [vmem:[%s4890_s3 + $0x38] sm:$0xff] }
 0x28f   : > { %v3399_v5 = vmax.f32 %v3383_v50, 0.0  ;;  %v4566_v20 = vadd.f32 %v3323_v14, %v1879_v55  ;;  %v4731_v50 = vld [vmem:[%s4890_s3 + $0x30] sm:$0xff] }
 0x290   : > { %v3386_v36 = vadd.f32 %v4565_v8, %v5633_v59 }
 0x291   : > { %v3385_v47 = vadd.f32 %v4566_v20, %v5633_v59  ;;  %v4519_v62 = vpop.f32.mrb[8].mxu1  ;;  %4537 = vmatprep.mubr.msk.f32.mxu0 %vm923_vm1, %v3399_v5 }
 0x292   : > { %v4567_v2 = vadd.f32 %v4519_v62, %v5622_v60  ;;  %v3333_v7 = vpop.f32.mrb[9].mxu1  ;;  %4538 = vmatmul.mubr.msk.f32.gmra.mrb[44].mxu0 %vm923_vm1, %v3400_v34  ;;  %v3402_v43 = vmax.f32 %v3386_v36, 0.0 }
 0x293   : > { %v3401_v26 = vmax.f32 %v3385_v47, 0.0  ;;  %v4568_v15 = vadd.f32 %v3333_v7, %v5624_v44  ;;  %v4732_v47 = vld [vmem:[%s4890_s3 + $0x48] sm:$0xff] }
 0x294   : > { %v3388_v51 = vadd.f32 %v4567_v2, %v5633_v59  ;;  %v4733_v2 = vld [vmem:[%s4890_s3 + $0x40] sm:$0xff] }
 0x295   : > { %v3387_v54 = vadd.f32 %v4568_v15, %v5633_v59  ;;  %v4522_v55 = vpop.f32.mrb[10].mxu1  ;;  %4540 = vmatprep.mubr.msk.f32.mxu0 %vm923_vm1, %v3401_v26 }
 0x296   : > { %v4569_v37 = vadd.f32 %v4522_v55, %v5626_v6  ;;  %v3343_v46 = vpop.f32.mrb[11].mxu1  ;;  %4541 = vmatmul.mubr.msk.f32.gmra.mrb[46].mxu0 %vm923_vm1, %v3402_v43  ;;  %v3404_v11 = vmax.f32 %v3388_v51, 0.0 }
 0x297   : > { %v3403_v60 = vmax.f32 %v3387_v54, 0.0  ;;  %v4570_v45 = vadd.f32 %v3343_v46, %v5628_v21  ;;  %v5674_v21 = vld [vmem:[%s5770_s8] ss:$0 sm:$0xff] }
 0x298   : > { %v3390_v44 = vadd.f32 %v4569_v37, %v5633_v59  ;;  %v4734_v37 = vld [vmem:[%s4890_s3 + $0x58] sm:$0xff] }
 0x299   : > { %v3389_v29 = vadd.f32 %v4570_v45, %v5633_v59  ;;  %4543 = vmatprep.mubr.msk.f32.mxu0 %vm923_vm1, %v3403_v60  ;;  %v4735_v60 = vld [vmem:[%s4890_s3 + $0x50] sm:$0xff] }
 0x29a   : > { %4544 = vmatmul.mubr.msk.f32.gmra.mrb[48].mxu0 %vm923_vm1, %v3404_v11  ;;  %v3406_v6 = vmax.f32 %v3390_v44, 0.0 }
 0x29b   : > { %v3405_v19 = vmax.f32 %v3389_v29, 0.0 }
 0x29d   : > { %4546 = vmatprep.mubr.msk.f32.mxu0 %vm923_vm1, %v3405_v19 }
 0x29e   : > { %4547 = vmatmul.mubr.msk.f32.gmra.mrb[50].mxu0 %vm923_vm1, %v3406_v6 }
 0x355   : > { %v4527_v16 = vpop.f32.mrb[36].mxu0 }
 0x356   : > { %v3538_v48 = vadd.f32 %v4527_v16, %v5674_v21  ;;  %v3532_v59 = vpop.f32.mrb[37].mxu0 }
 0x357   : > { %v3533_v17 = vadd.f32 %v5674_v21, %v3532_v59 }
 0x358   : > { %v3612_v4 = vadd.f32 %v4724_v63, %v3538_v48  ;;  %v4736_v48 = vld [vmem:[%s4890_s3 + $0x68] sm:$0xff] }
 0x359   : > { %v3611_v57 = vadd.f32 %v4725_v13, %v3533_v17  ;;  %v4530_v32 = vpop.f32.mrb[38].mxu0  ;;  %v4737_v17 = vld [vmem:[%s4890_s3 + $0x60] sm:$0xff] }
 0x35a   : > { %v3628_v28 = vmax.f32 %v3612_v4, 0.0  ;;  %v3548_v53 = vadd.f32 %v4530_v32, %v5674_v21  ;;  %v3542_v58 = vpop.f32.mrb[39].mxu0 }
 0x35b   : > { %v3627_v23 = vmax.f32 %v3611_v57, 0.0  ;;  %v3543_v0 = vadd.f32 %v5674_v21, %v3542_v58  ;;  %v4738_v58 = vld [vmem:[%s4890_s3 + $0x78] sm:$0xff] }
 0x35c   : > { %3644 = vst.msk [vmem:[%s5684_s30 + $0x8] sm:$0xff] %vm534_vm0, %v3628_v28  ;;  %v3614_v3 = vadd.f32 %v4726_v33, %v3548_v53 }
 0x35d   : > { %3643 = vst.msk [vmem:[%s5684_s30] sm:$0xff] %vm534_vm0, %v3627_v23  ;;  %v3613_v25 = vadd.f32 %v4727_v10, %v3543_v0  ;;  %v4533_v40 = vpop.f32.mrb[40].mxu0  ;;  %v4739_v0 = vld [vmem:[%s4890_s3 + $0x70] sm:$0xff] }
 0x35e   : > { %v3630_v12 = vmax.f32 %v3614_v3, 0.0  ;;  %v3558_v31 = vadd.f32 %v4533_v40, %v5674_v21  ;;  %v3552_v61 = vpop.f32.mrb[41].mxu0 }
 0x35f   : > { %v3629_v42 = vmax.f32 %v3613_v25, 0.0  ;;  %v3553_v35 = vadd.f32 %v5674_v21, %v3552_v61 }
 0x360   : > { %3646 = vst.msk [vmem:[%s5684_s30 + $0x18] sm:$0xff] %vm534_vm0, %v3630_v12  ;;  %v3616_v49 = vadd.f32 %v4728_v30, %v3558_v31 }
 0x361   : > { %3645 = vst.msk [vmem:[%s5684_s30 + $0x10] sm:$0xff] %vm534_vm0, %v3629_v42  ;;  %v3615_v27 = vadd.f32 %v4729_v38, %v3553_v35  ;;  %v4536_v18 = vpop.f32.mrb[42].mxu0 }
 0x362   : > { %v3632_v41 = vmax.f32 %v3616_v49, 0.0  ;;  %v3568_v22 = vadd.f32 %v4536_v18, %v5674_v21  ;;  %v3562_v24 = vpop.f32.mrb[43].mxu0 }
 0x363   : > { %v3631_v52 = vmax.f32 %v3615_v27, 0.0  ;;  %v3563_v1 = vadd.f32 %v5674_v21, %v3562_v24 }
 0x364   : > { %3648 = vst.msk [vmem:[%s5684_s30 + $0x28] sm:$0xff] %vm534_vm0, %v3632_v41  ;;  %v3618_v39 = vadd.f32 %v4730_v9, %v3568_v22 }
 0x365   : > { %3647 = vst.msk [vmem:[%s5684_s30 + $0x20] sm:$0xff] %vm534_vm0, %v3631_v52  ;;  %v3617_v56 = vadd.f32 %v4731_v50, %v3563_v1  ;;  %v4539_v8 = vpop.f32.mrb[44].mxu0 }
 0x366   : > { %v3634_v14 = vmax.f32 %v3618_v39, 0.0  ;;  %v3578_v5 = vadd.f32 %v4539_v8, %v5674_v21  ;;  %v3572_v20 = vpop.f32.mrb[45].mxu0 }
 0x367   : > { %v3633_v34 = vmax.f32 %v3617_v56, 0.0  ;;  %v3573_v36 = vadd.f32 %v5674_v21, %v3572_v20 }
 0x368   : > { %3650 = vst.msk [vmem:[%s5684_s30 + $0x38] sm:$0xff] %vm534_vm0, %v3634_v14  ;;  %v3620_v62 = vadd.f32 %v4732_v47, %v3578_v5 }
 0x369   : > { %3649 = vst.msk [vmem:[%s5684_s30 + $0x30] sm:$0xff] %vm534_vm0, %v3633_v34  ;;  %v3619_v7 = vadd.f32 %v4733_v2, %v3573_v36  ;;  %v4542_v26 = vpop.f32.mrb[46].mxu0 }
 0x36a   : > { %v3636_v15 = vmax.f32 %v3620_v62, 0.0  ;;  %v3588_v43 = vadd.f32 %v4542_v26, %v5674_v21  ;;  %v3582_v51 = vpop.f32.mrb[47].mxu0 }
 0x36b   : > { %v3635_v54 = vmax.f32 %v3619_v7, 0.0  ;;  %v3583_v55 = vadd.f32 %v5674_v21, %v3582_v51 }
 0x36c   : > { %3652 = vst.msk [vmem:[%s5684_s30 + $0x48] sm:$0xff] %vm534_vm0, %v3636_v15  ;;  %v3622_v46 = vadd.f32 %v4734_v37, %v3588_v43 }
 0x36d   : > { %3651 = vst.msk [vmem:[%s5684_s30 + $0x40] sm:$0xff] %vm534_vm0, %v3635_v54  ;;  %v3621_v45 = vadd.f32 %v4735_v60, %v3583_v55  ;;  %v4545_v11 = vpop.f32.mrb[48].mxu0 }
 0x36e   : > { %v3638_v44 = vmax.f32 %v3622_v46, 0.0  ;;  %v3598_v29 = vadd.f32 %v4545_v11, %v5674_v21  ;;  %v3592_v19 = vpop.f32.mrb[49].mxu0 }
 0x36f   : > { %v3637_v6 = vmax.f32 %v3621_v45, 0.0  ;;  %v3593_v16 = vadd.f32 %v5674_v21, %v3592_v19 }
 0x370   : > { %3654 = vst.msk [vmem:[%s5684_s30 + $0x58] sm:$0xff] %vm534_vm0, %v3638_v44  ;;  %v3624_v59 = vadd.f32 %v4736_v48, %v3598_v29 }
 0x371   : > { %3653 = vst.msk [vmem:[%s5684_s30 + $0x50] sm:$0xff] %vm534_vm0, %v3637_v6  ;;  %v3623_v63 = vadd.f32 %v4737_v17, %v3593_v16  ;;  %v4548_v4 = vpop.f32.mrb[50].mxu0 }
 0x372   : > { %v3640_v13 = vmax.f32 %v3624_v59, 0.0  ;;  %v3608_v57 = vadd.f32 %v4548_v4, %v5674_v21  ;;  %v3602_v32 = vpop.f32.mrb[51].mxu0 }
 0x373   : > { %v3639_v28 = vmax.f32 %v3623_v63, 0.0  ;;  %v3603_v53 = vadd.f32 %v5674_v21, %v3602_v32 }
 0x374   : > { %3656 = vst.msk [vmem:[%s5684_s30 + $0x68] sm:$0xff] %vm534_vm0, %v3640_v13  ;;  %v3626_v23 = vadd.f32 %v4738_v58, %v3608_v57 }
 0x375   : > { %3655 = vst.msk [vmem:[%s5684_s30 + $0x60] sm:$0xff] %vm534_vm0, %v3639_v28  ;;  %v3625_v33 = vadd.f32 %v4739_v0, %v3603_v53 }
 0x376   : > { %v3642_v3 = vmax.f32 %v3626_v23, 0.0 }
 0x377   : > { %v3641_v10 = vmax.f32 %v3625_v33, 0.0 }
 0x378   : > { %3658 = vst.msk [vmem:[%s5684_s30 + $0x78] sm:$0xff] %vm534_vm0, %v3642_v3 }
 0x379   : > { %3657 = vst.msk [vmem:[%s5684_s30 + $0x70] sm:$0xff] %vm534_vm0, %v3641_v10 }
 0x37a PF: > { %s19_s13 = sadd.s32 1, %s4778_s13   ;;  %s5799_s30 = smov %s4770_s11 }
 0x37b   : > { %p16_p12 = scmp.ge.s32.totalorder %s19_s13, 6   ;;  %s5800_s10 = smov %s4774_s12 }
 0x37c   : > { %s5801_s11 = smov %s5804_s14  ;;  %s5802_s12 = smov %s5808_s15 }
 0x37d   :  { %18 = sbr.rel (!%p16_p12) target bundleno = 3 (0x3), region = 100 }

</bundles_post_ra>
